<compile_context>
chip_gen: v7x
topology: tpu7x:2x2x1
jax: 0.10.0
libtpu: 0.0.40
codegen_flags: <defaults>
</compile_context>

<pallas_src>
import functools

import jax
import jax.numpy as jnp
from jax.experimental import pallas as pl
from jax.experimental.pallas import tpu as pltpu

_MiB = 1024 * 1024


def _phase_shift_schedule(maxdisp):
    """Group disparities by right-image sampling phase so each phase tile is
    loaded/converted exactly once.  Disparity i samples feat_r at column
    4*w - i == 4*(w - shift) + phase; columns < 0 read the zero pad."""
    per_phase = [[] for _ in range(4)]
    for i in range(maxdisp):
        q, rem = divmod(i, 4)
        if rem == 0:
            per_phase[0].append((q, i))            # phase 0, shift q
        else:
            per_phase[4 - rem].append((q + 1, i))  # phase 4-rem, shift q+1
    return per_phase


def _build_volume_kernel(l_ref, r_ref, o_ref, *, maxdisp, compute_dtype):
    # l_ref: (1, C, tH, W)   r_ref: (1, 4, C, tH, Wp)   o_ref: (1, maxdisp, tH, W)
    W = l_ref.shape[3]

    # Hoisted: one load + convert of feat_l per grid step (not per disparity).
    l = l_ref[0].astype(compute_dtype)                       # (C, tH, W)

    for phase, tasks in enumerate(_phase_shift_schedule(maxdisp)):
        if not tasks:
            continue
        # One load + convert per phase (4 total instead of maxdisp).
        rp_full = r_ref[0, phase].astype(compute_dtype)      # (C, tH, Wp)
        for shift, i in tasks:
            if shift == 0:
                rp = rp_full[:, :, :W]
            else:
                # Right shift along W with left zero-fill: the wrapper right-padded
                # r_ph with >= max-shift zero columns, so the roll wrap-around
                # supplies the zeros -- no mask / select needed (XLU roll only).
                rp = pltpu.roll(rp_full, shift, axis=2)[:, :, :W]
            # L1 over channels: leading-axis reduction -> pure VPU adds, f32 accum.
            o_ref[0, i] = jnp.sum(jnp.abs(l - rp).astype(jnp.float32), axis=0)


def _sublane_multiple(dtype):
    # Native sublane tiling: (8,128) f32, (16,128) bf16/f16, (32,128) int8/fp8.
    return {4: 8, 2: 16, 1: 32}.get(jnp.dtype(dtype).itemsize, 8)


def _working_set_bytes(th, C, W, Wp, maxdisp, in_bytes, cbytes):
    """Honest per-grid-step VMEM estimate: double-buffered DMA blocks plus the
    in-kernel staging temporaries (hoisted l, one phase tile, rolled/diff temps)."""
    pipelined = 2 * th * (C * (W + 4 * Wp) * in_bytes + maxdisp * W * 4)
    temporaries = th * C * (W + Wp + 2 * W) * cbytes
    return pipelined + temporaries


def _pick_tile_h(H, C, W, Wp, maxdisp, in_bytes, cbytes, budget_bytes, gran):
    cands = sorted({d for d in range(gran, H + 1, gran) if H % d == 0} | {H})
    fitting = [d for d in cands
               if _working_set_bytes(d, C, W, Wp, maxdisp, in_bytes, cbytes)
               <= budget_bytes]
    return max(fitting) if fitting else min(cands)


def _vmem_capacity_bytes():
    try:
        return int(pltpu.get_tpu_info().vmem_capacity_bytes)
    except Exception:
        return 128 * _MiB   # v5e / v6e default


def build_volume_2d(feat_l, feat_r, maxdisp, *, tile_h=None, compute_dtype=None,
                    vmem_budget_bytes=None, vmem_limit_bytes=None):
    """feat_l: (B,C,H,W), feat_r: (B,C,H,4W)  ->  cost volume (B,maxdisp,H,W) f32."""
    B, C, H, Wl = feat_l.shape
    Br, Cr, Hr, Wr = feat_r.shape
    assert (B, C, H) == (Br, Cr, Hr) and Wr == 4 * Wl, (feat_l.shape, feat_r.shape)
    assert maxdisp >= 1

    # compute_dtype: f32 everywhere by default.  On v6e/v7x with bf16 inputs the
    # subtract/abs can run in bf16 (~2x VALU throughput, accumulation stays f32);
    # keep f32 on v5e (no bf16 VPU).
    if compute_dtype is None:
        compute_dtype = jnp.float32

    # Zero columns appended on the right of the de-interleaved width so that
    # pltpu.roll's wrap-around supplies the left zero-fill for every shift used.
    max_shift = (maxdisp - 1 + 3) // 4
    Wp = Wl + max_shift
    if Wl % 128 == 0 and Wp % 128 != 0:
        Wp = ((Wp + 127) // 128) * 128      # keep production tiles lane-aligned
    pad_w = Wp - Wl

    # Single fused wrapper pass over feat_r: de-interleave the 4 sampling phases to
    # leading (non-vreg) axes AND fold in the zero right-pad, so feat_r is read and
    # rewritten exactly once before the kernel (kept in its native dtype).
    # TODO(synk): fuse this de-interleave into the kernel (strided lane slices /
    # pltpu.einshape on the XLU) to drop the extra HBM materialization entirely.
    r_ph = jnp.transpose(feat_r.reshape(B, C, H, Wl, 4), (0, 4, 1, 2, 3))
    if pad_w:
        r_ph = jnp.pad(r_ph, ((0, 0), (0, 0), (0, 0), (0, 0), (0, pad_w)))

    in_bytes = jnp.dtype(feat_l.dtype).itemsize
    cbytes = jnp.dtype(compute_dtype).itemsize

    # Per-generation VMEM sizing (v7x: 64 MiB / TC, v5e / v6e: 128 MiB).
    capacity = _vmem_capacity_bytes()
    cap_limit = max(32 * _MiB, min(100 * _MiB, capacity - 16 * _MiB))
    if vmem_budget_bytes is None:
        vmem_budget_bytes = max(16 * _MiB, cap_limit - 8 * _MiB)

    gran = _sublane_multiple(feat_l.dtype)
    if tile_h is None:
        tH = _pick_tile_h(H, C, Wl, Wp, maxdisp, in_bytes, cbytes,
                          vmem_budget_bytes, gran)
    else:
        tH = tile_h
    assert H % tH == 0 and (tH % 8 == 0 or tH == H), (H, tH)

    if vmem_limit_bytes is None:
        ws = _working_set_bytes(tH, C, Wl, Wp, maxdisp, in_bytes, cbytes)
        vmem_limit_bytes = int(min(cap_limit, max(32 * _MiB, ws + 8 * _MiB)))

    # TODO(synk): for very large maxdisp, add a third ("arbitrary") grid axis over
    # disparity groups so the resident output block shrinks on v7x's 64 MiB VMEM.
    # TODO(synk): if production W is not a multiple of 128, pad W to the next
    # 128 boundary around the call (and crop) for lane-dense stores.
    kernel = functools.partial(_build_volume_kernel, maxdisp=maxdisp,
                               compute_dtype=compute_dtype)
    return pl.pallas_call(
        kernel,
        out_shape=jax.ShapeDtypeStruct((B, maxdisp, H, Wl), jnp.float32),
        grid_spec=pltpu.PrefetchScalarGridSpec(
            num_scalar_prefetch=0,
            grid=(B, H // tH),
            in_specs=[
                pl.BlockSpec((1, C, tH, Wl), lambda b, h: (b, 0, h, 0)),
                pl.BlockSpec((1, 4, C, tH, Wp), lambda b, h: (b, 0, 0, h, 0)),
            ],
            out_specs=pl.BlockSpec((1, maxdisp, tH, Wl), lambda b, h: (b, 0, h, 0)),
        ),
        compiler_params=pltpu.CompilerParams(
            dimension_semantics=("parallel", "parallel"),
            vmem_limit_bytes=vmem_limit_bytes,
        ),
    )(feat_l, r_ph)


def build_volume_2d_ref(feat_l, feat_r, maxdisp):
    """Direct JAX translation of the PyTorch forward (correctness check)."""
    pad = jnp.pad(feat_r, ((0, 0), (0, 0), (0, 0), (maxdisp - 1, 0)))
    Wp = pad.shape[3]
    slices = []
    for i in range(maxdisp):
        if i > 0:
            sl = pad[:, :, :, maxdisp - 1 - i: Wp - i: 4]
        else:
            sl = pad[:, :, :, maxdisp - 1:: 4]
        slices.append(jnp.sum(jnp.abs(feat_l - sl), axis=1))
    return jnp.stack(slices, axis=1).astype(jnp.float32)


if __name__ == "__main__":
    key = jax.random.PRNGKey(0)
    k_l, k_r, k_l2, k_r2 = jax.random.split(key, 4)

    # Small shapes consistent with the module (feat_r is 4x wider than feat_l).
    B, C, H, Wl, maxdisp = 2, 8, 16, 16, 8
    feat_l = jax.random.normal(k_l, (B, C, H, Wl), dtype=jnp.float32)
    feat_r = jax.random.normal(k_r, (B, C, H, 4 * Wl), dtype=jnp.float32)

    ref = jax.block_until_ready(build_volume_2d_ref(feat_l, feat_r, maxdisp))

    # Auto-picked H tile.
    cost = jax.block_until_ready(build_volume_2d(feat_l, feat_r, maxdisp))
    assert cost.shape == (B, maxdisp, H, Wl), cost.shape
    assert cost.dtype == jnp.float32
    assert jnp.max(jnp.abs(cost - ref)) < 1e-4, float(jnp.max(jnp.abs(cost - ref)))

    # Forced multi-step H tiling (grid = (B, H//8)) exercises the tiled index maps.
    cost_t = jax.block_until_ready(build_volume_2d(feat_l, feat_r, maxdisp, tile_h=8))
    assert jnp.max(jnp.abs(cost_t - ref)) < 1e-4, float(jnp.max(jnp.abs(cost_t - ref)))

    # maxdisp larger than 4*W: exercises shifts past the image edge (all-zero R).
    B2, C2, H2, W2, md2 = 1, 4, 8, 8, 40
    feat_l2 = jax.random.normal(k_l2, (B2, C2, H2, W2), dtype=jnp.float32)
    feat_r2 = jax.random.normal(k_r2, (B2, C2, H2, 4 * W2), dtype=jnp.float32)
    ref2 = jax.block_until_ready(build_volume_2d_ref(feat_l2, feat_r2, md2))
    cost2 = jax.block_until_ready(build_volume_2d(feat_l2, feat_r2, md2))
    assert jnp.max(jnp.abs(cost2 - ref2)) < 1e-4, float(jnp.max(jnp.abs(cost2 - ref2)))

    print("KERNEL_OK")
</pallas_src>

<mosaic_0001>
module attributes {stable_mosaic.version = 11 : i64} {
  func.func @_build_volume_kernel(%arg0: i32, %arg1: i32, %arg2: memref<1x8x16x16xf32, #tpu.memory_space<vmem>>, %arg3: memref<1x4x8x16x18xf32, #tpu.memory_space<vmem>>, %arg4: memref<1x8x16x16xf32, #tpu.memory_space<vmem>>) attributes {dimension_semantics = [#tpu.dimension_semantics<parallel>, #tpu.dimension_semantics<parallel>], iteration_bounds = array<i64: 2, 1>, scalar_prefetch = 0 : i64, scratch_operands = 0 : i64, tpu.core_type = #tpu.core_type<tc>, window_params = [{transform_indices = @transform_0, window_bounds = array<i64: 1, 8, 16, 16>}, {transform_indices = @transform_1, window_bounds = array<i64: 1, 4, 8, 16, 18>}, {transform_indices = @transform_2, window_bounds = array<i64: 1, 8, 16, 16>}]} {
    %c0 = arith.constant 0 : index
    %c0_0 = arith.constant 0 : index
    %c0_1 = arith.constant 0 : index
    %c0_2 = arith.constant 0 : index
    %0 = vector.load %arg2[%c0, %c0_0, %c0_1, %c0_2] : memref<1x8x16x16xf32, #tpu.memory_space<vmem>>, vector<1x8x16x16xf32>
    %1 = vector.shape_cast %0 : vector<1x8x16x16xf32> to vector<8x16x16xf32>
    %c0_3 = arith.constant 0 : index
    %c0_4 = arith.constant 0 : index
    %c0_5 = arith.constant 0 : index
    %c0_6 = arith.constant 0 : index
    %c0_7 = arith.constant 0 : index
    %2 = vector.load %arg3[%c0_3, %c0_4, %c0_5, %c0_6, %c0_7] : memref<1x4x8x16x18xf32, #tpu.memory_space<vmem>>, vector<1x1x8x16x18xf32>
    %3 = vector.shape_cast %2 : vector<1x1x8x16x18xf32> to vector<8x16x18xf32>
    %4 = vector.extract_strided_slice %3 {offsets = [0, 0, 0], sizes = [8, 16, 16], strides = [1, 1, 1]} : vector<8x16x18xf32> to vector<8x16x16xf32>
    %5 = arith.subf %1, %4 : vector<8x16x16xf32>
    %6 = math.absf %5 : vector<8x16x16xf32>
    %cst = arith.constant dense<0.000000e+00> : vector<16x16xf32>
    %7 = vector.multi_reduction <add>, %6, %cst [0] : vector<8x16x16xf32> to vector<16x16xf32>
    %c0_8 = arith.constant 0 : index
    %c0_9 = arith.constant 0 : index
    %c0_10 = arith.constant 0 : index
    %c0_11 = arith.constant 0 : index
    %8 = vector.load %arg4[%c0_8, %c0_9, %c0_10, %c0_11] : memref<1x8x16x16xf32, #tpu.memory_space<vmem>>, vector<1x1x16x16xf32>
    %9 = vector.shape_cast %8 : vector<1x1x16x16xf32> to vector<16x16xf32>
    %10 = vector.shape_cast %7 : vector<16x16xf32> to vector<1x1x16x16xf32>
    tpu.vector_store %arg4[%c0_8, %c0_9, %c0_10, %c0_11], %10 {strides = array<i32>} : memref<1x8x16x16xf32, #tpu.memory_space<vmem>>, vector<1x1x16x16xf32>,
    %c1_i32 = arith.constant 1 : i32
    %11 = tpu.dynamic_rotate %3 by %c1_i32 dim 2 : vector<8x16x18xf32>, i32 -> vector<8x16x18xf32>
    %12 = vector.extract_strided_slice %11 {offsets = [0, 0, 0], sizes = [8, 16, 16], strides = [1, 1, 1]} : vector<8x16x18xf32> to vector<8x16x16xf32>
    %13 = arith.subf %1, %12 : vector<8x16x16xf32>
    %14 = math.absf %13 : vector<8x16x16xf32>
    %cst_12 = arith.constant dense<0.000000e+00> : vector<16x16xf32>
    %15 = vector.multi_reduction <add>, %14, %cst_12 [0] : vector<8x16x16xf32> to vector<16x16xf32>
    %c0_13 = arith.constant 0 : index
    %c4 = arith.constant 4 : index
    %c0_14 = arith.constant 0 : index
    %c0_15 = arith.constant 0 : index
    %16 = vector.load %arg4[%c0_13, %c4, %c0_14, %c0_15] : memref<1x8x16x16xf32, #tpu.memory_space<vmem>>, vector<1x1x16x16xf32>
    %17 = vector.shape_cast %16 : vector<1x1x16x16xf32> to vector<16x16xf32>
    %18 = vector.shape_cast %15 : vector<16x16xf32> to vector<1x1x16x16xf32>
    tpu.vector_store %arg4[%c0_13, %c4, %c0_14, %c0_15], %18 {strides = array<i32>} : memref<1x8x16x16xf32, #tpu.memory_space<vmem>>, vector<1x1x16x16xf32>,
    %c0_16 = arith.constant 0 : index
    %c1 = arith.constant 1 : index
    %c0_17 = arith.constant 0 : index
    %c0_18 = arith.constant 0 : index
    %c0_19 = arith.constant 0 : index
    %19 = vector.load %arg3[%c0_16, %c1, %c0_17, %c0_18, %c0_19] : memref<1x4x8x16x18xf32, #tpu.memory_space<vmem>>, vector<1x1x8x16x18xf32>
    %20 = vector.shape_cast %19 : vector<1x1x8x16x18xf32> to vector<8x16x18xf32>
    %c1_i32_20 = arith.constant 1 : i32
    %21 = tpu.dynamic_rotate %20 by %c1_i32_20 dim 2 : vector<8x16x18xf32>, i32 -> vector<8x16x18xf32>
    %22 = vector.extract_strided_slice %21 {offsets = [0, 0, 0], sizes = [8, 16, 16], strides = [1, 1, 1]} : vector<8x16x18xf32> to vector<8x16x16xf32>
    %23 = arith.subf %1, %22 : vector<8x16x16xf32>
    %24 = math.absf %23 : vector<8x16x16xf32>
    %cst_21 = arith.constant dense<0.000000e+00> : vector<16x16xf32>
    %25 = vector.multi_reduction <add>, %24, %cst_21 [0] : vector<8x16x16xf32> to vector<16x16xf32>
    %c0_22 = arith.constant 0 : index
    %c3 = arith.constant 3 : index
    %c0_23 = arith.constant 0 : index
    %c0_24 = arith.constant 0 : index
    %26 = vector.load %arg4[%c0_22, %c3, %c0_23, %c0_24] : memref<1x8x16x16xf32, #tpu.memory_space<vmem>>, vector<1x1x16x16xf32>
    %27 = vector.shape_cast %26 : vector<1x1x16x16xf32> to vector<16x16xf32>
    %28 = vector.shape_cast %25 : vector<16x16xf32> to vector<1x1x16x16xf32>
    tpu.vector_store %arg4[%c0_22, %c3, %c0_23, %c0_24], %28 {strides = array<i32>} : memref<1x8x16x16xf32, #tpu.memory_space<vmem>>, vector<1x1x16x16xf32>,
    %c2_i32 = arith.constant 2 : i32
    %29 = tpu.dynamic_rotate %20 by %c2_i32 dim 2 : vector<8x16x18xf32>, i32 -> vector<8x16x18xf32>
    %30 = vector.extract_strided_slice %29 {offsets = [0, 0, 0], sizes = [8, 16, 16], strides = [1, 1, 1]} : vector<8x16x18xf32> to vector<8x16x16xf32>
    %31 = arith.subf %1, %30 : vector<8x16x16xf32>
    %32 = math.absf %31 : vector<8x16x16xf32>
    %cst_25 = arith.constant dense<0.000000e+00> : vector<16x16xf32>
    %33 = vector.multi_reduction <add>, %32, %cst_25 [0] : vector<8x16x16xf32> to vector<16x16xf32>
    %c0_26 = arith.constant 0 : index
    %c7 = arith.constant 7 : index
    %c0_27 = arith.constant 0 : index
    %c0_28 = arith.constant 0 : index
    %34 = vector.load %arg4[%c0_26, %c7, %c0_27, %c0_28] : memref<1x8x16x16xf32, #tpu.memory_space<vmem>>, vector<1x1x16x16xf32>
    %35 = vector.shape_cast %34 : vector<1x1x16x16xf32> to vector<16x16xf32>
    %36 = vector.shape_cast %33 : vector<16x16xf32> to vector<1x1x16x16xf32>
    tpu.vector_store %arg4[%c0_26, %c7, %c0_27, %c0_28], %36 {strides = array<i32>} : memref<1x8x16x16xf32, #tpu.memory_space<vmem>>, vector<1x1x16x16xf32>,
    %c0_29 = arith.constant 0 : index
    %c2 = arith.constant 2 : index
    %c0_30 = arith.constant 0 : index
    %c0_31 = arith.constant 0 : index
    %c0_32 = arith.constant 0 : index
    %37 = vector.load %arg3[%c0_29, %c2, %c0_30, %c0_31, %c0_32] : memref<1x4x8x16x18xf32, #tpu.memory_space<vmem>>, vector<1x1x8x16x18xf32>
    %38 = vector.shape_cast %37 : vector<1x1x8x16x18xf32> to vector<8x16x18xf32>
    %c1_i32_33 = arith.constant 1 : i32
    %39 = tpu.dynamic_rotate %38 by %c1_i32_33 dim 2 : vector<8x16x18xf32>, i32 -> vector<8x16x18xf32>
    %40 = vector.extract_strided_slice %39 {offsets = [0, 0, 0], sizes = [8, 16, 16], strides = [1, 1, 1]} : vector<8x16x18xf32> to vector<8x16x16xf32>
    %41 = arith.subf %1, %40 : vector<8x16x16xf32>
    %42 = math.absf %41 : vector<8x16x16xf32>
    %cst_34 = arith.constant dense<0.000000e+00> : vector<16x16xf32>
    %43 = vector.multi_reduction <add>, %42, %cst_34 [0] : vector<8x16x16xf32> to vector<16x16xf32>
    %c0_35 = arith.constant 0 : index
    %c2_36 = arith.constant 2 : index
    %c0_37 = arith.constant 0 : index
    %c0_38 = arith.constant 0 : index
    %44 = vector.load %arg4[%c0_35, %c2_36, %c0_37, %c0_38] : memref<1x8x16x16xf32, #tpu.memory_space<vmem>>, vector<1x1x16x16xf32>
    %45 = vector.shape_cast %44 : vector<1x1x16x16xf32> to vector<16x16xf32>
    %46 = vector.shape_cast %43 : vector<16x16xf32> to vector<1x1x16x16xf32>
    tpu.vector_store %arg4[%c0_35, %c2_36, %c0_37, %c0_38], %46 {strides = array<i32>} : memref<1x8x16x16xf32, #tpu.memory_space<vmem>>, vector<1x1x16x16xf32>,
    %c2_i32_39 = arith.constant 2 : i32
    %47 = tpu.dynamic_rotate %38 by %c2_i32_39 dim 2 : vector<8x16x18xf32>, i32 -> vector<8x16x18xf32>
    %48 = vector.extract_strided_slice %47 {offsets = [0, 0, 0], sizes = [8, 16, 16], strides = [1, 1, 1]} : vector<8x16x18xf32> to vector<8x16x16xf32>
    %49 = arith.subf %1, %48 : vector<8x16x16xf32>
    %50 = math.absf %49 : vector<8x16x16xf32>
    %cst_40 = arith.constant dense<0.000000e+00> : vector<16x16xf32>
    %51 = vector.multi_reduction <add>, %50, %cst_40 [0] : vector<8x16x16xf32> to vector<16x16xf32>
    %c0_41 = arith.constant 0 : index
    %c6 = arith.constant 6 : index
    %c0_42 = arith.constant 0 : index
    %c0_43 = arith.constant 0 : index
    %52 = vector.load %arg4[%c0_41, %c6, %c0_42, %c0_43] : memref<1x8x16x16xf32, #tpu.memory_space<vmem>>, vector<1x1x16x16xf32>
    %53 = vector.shape_cast %52 : vector<1x1x16x16xf32> to vector<16x16xf32>
    %54 = vector.shape_cast %51 : vector<16x16xf32> to vector<1x1x16x16xf32>
    tpu.vector_store %arg4[%c0_41, %c6, %c0_42, %c0_43], %54 {strides = array<i32>} : memref<1x8x16x16xf32, #tpu.memory_space<vmem>>, vector<1x1x16x16xf32>,
    %c0_44 = arith.constant 0 : index
    %c3_45 = arith.constant 3 : index
    %c0_46 = arith.constant 0 : index
    %c0_47 = arith.constant 0 : index
    %c0_48 = arith.constant 0 : index
    %55 = vector.load %arg3[%c0_44, %c3_45, %c0_46, %c0_47, %c0_48] : memref<1x4x8x16x18xf32, #tpu.memory_space<vmem>>, vector<1x1x8x16x18xf32>
    %56 = vector.shape_cast %55 : vector<1x1x8x16x18xf32> to vector<8x16x18xf32>
    %c1_i32_49 = arith.constant 1 : i32
    %57 = tpu.dynamic_rotate %56 by %c1_i32_49 dim 2 : vector<8x16x18xf32>, i32 -> vector<8x16x18xf32>
    %58 = vector.extract_strided_slice %57 {offsets = [0, 0, 0], sizes = [8, 16, 16], strides = [1, 1, 1]} : vector<8x16x18xf32> to vector<8x16x16xf32>
    %59 = arith.subf %1, %58 : vector<8x16x16xf32>
    %60 = math.absf %59 : vector<8x16x16xf32>
    %cst_50 = arith.constant dense<0.000000e+00> : vector<16x16xf32>
    %61 = vector.multi_reduction <add>, %60, %cst_50 [0] : vector<8x16x16xf32> to vector<16x16xf32>
    %c0_51 = arith.constant 0 : index
    %c1_52 = arith.constant 1 : index
    %c0_53 = arith.constant 0 : index
    %c0_54 = arith.constant 0 : index
    %62 = vector.load %arg4[%c0_51, %c1_52, %c0_53, %c0_54] : memref<1x8x16x16xf32, #tpu.memory_space<vmem>>, vector<1x1x16x16xf32>
    %63 = vector.shape_cast %62 : vector<1x1x16x16xf32> to vector<16x16xf32>
    %64 = vector.shape_cast %61 : vector<16x16xf32> to vector<1x1x16x16xf32>
    tpu.vector_store %arg4[%c0_51, %c1_52, %c0_53, %c0_54], %64 {strides = array<i32>} : memref<1x8x16x16xf32, #tpu.memory_space<vmem>>, vector<1x1x16x16xf32>,
    %c2_i32_55 = arith.constant 2 : i32
    %65 = tpu.dynamic_rotate %56 by %c2_i32_55 dim 2 : vector<8x16x18xf32>, i32 -> vector<8x16x18xf32>
    %66 = vector.extract_strided_slice %65 {offsets = [0, 0, 0], sizes = [8, 16, 16], strides = [1, 1, 1]} : vector<8x16x18xf32> to vector<8x16x16xf32>
    %67 = arith.subf %1, %66 : vector<8x16x16xf32>
    %68 = math.absf %67 : vector<8x16x16xf32>
    %cst_56 = arith.constant dense<0.000000e+00> : vector<16x16xf32>
    %69 = vector.multi_reduction <add>, %68, %cst_56 [0] : vector<8x16x16xf32> to vector<16x16xf32>
    %c0_57 = arith.constant 0 : index
    %c5 = arith.constant 5 : index
    %c0_58 = arith.constant 0 : index
    %c0_59 = arith.constant 0 : index
    %70 = vector.load %arg4[%c0_57, %c5, %c0_58, %c0_59] : memref<1x8x16x16xf32, #tpu.memory_space<vmem>>, vector<1x1x16x16xf32>
    %71 = vector.shape_cast %70 : vector<1x1x16x16xf32> to vector<16x16xf32>
    %72 = vector.shape_cast %69 : vector<16x16xf32> to vector<1x1x16x16xf32>
    tpu.vector_store %arg4[%c0_57, %c5, %c0_58, %c0_59], %72 {strides = array<i32>} : memref<1x8x16x16xf32, #tpu.memory_space<vmem>>, vector<1x1x16x16xf32>,
    return
  }
  func.func @transform_0(%arg0: i32, %arg1: i32) -> (i32, i32, i32, i32) {
    %c0_i32 = arith.constant 0 : i32
    %c0_i32_0 = arith.constant 0 : i32
    %c0_i32_1 = arith.constant 0 : i32
    return %arg0, %c0_i32, %arg1, %c0_i32_0 : i32, i32, i32, i32
  }
  func.func @transform_1(%arg0: i32, %arg1: i32) -> (i32, i32, i32, i32, i32) {
    %c0_i32 = arith.constant 0 : i32
    %c0_i32_0 = arith.constant 0 : i32
    %c0_i32_1 = arith.constant 0 : i32
    %c0_i32_2 = arith.constant 0 : i32
    return %arg0, %c0_i32, %c0_i32_0, %arg1, %c0_i32_1 : i32, i32, i32, i32, i32
  }
  func.func @transform_2(%arg0: i32, %arg1: i32) -> (i32, i32, i32, i32) {
    %c0_i32 = arith.constant 0 : i32
    %c0_i32_0 = arith.constant 0 : i32
    %c0_i32_1 = arith.constant 0 : i32
    return %arg0, %c0_i32, %arg1, %c0_i32_0 : i32, i32, i32, i32
  }
}

</mosaic_0001>

<bundles_post_ra>
// kernel: tpu_custom_call.1
= control target key start
LH: loop header
LB: loop body
LE: loop exit
PB: predicated region body
PF: predicated region fallthrough
CT: control target
= control target key end

     0   :  { %7 = vsyncpa [#allocation3], 0  ;;  %s3623_s0 = inlined_call_operand.hbm [shape: f32[2,8,16,16], index: 0, kind: input, shape index: {}]   ;;  %s3624_s1 = inlined_call_operand.hbm [shape: f32[2,4,8,16,18], index: 1, kind: input, shape index: {}]   ;;  %s3625_s2 = inlined_call_operand.hbm [shape: f32[2,8,16,16], index: 2, kind: output, shape index: {}]  }
   0x1   :  { %9 = vsyncpa [#allocation3 + $0x1], 0 }
   0x2   :  { %10 = vsyncpa [#allocation6], 0 }
   0x3   :  { %12 = vsyncpa [#allocation6 + $0x1], 0 }
   0x4   :  { %13 = vsyncpa [#allocation4], 0 }
   0x5   :  { %15 = vsyncpa [#allocation4 + $0x1], 0  ;;  %s2095_s9 = smov 0   ;;  %s2097_s10 = smov 0  }
   0x6   :  { %s2099_s11 = smov 0   ;;  %s2101_s12 = smov 0  }
   0x7   :  { %s2103_s13 = smov 0   ;;  %s2105_s14 = smov 0  }
   0x8 LB: > { %s1744_s15 = sadd.s32 4294967295, %s2068_s14   ;;  %s1745_s16 = sadd.s32 4294967294, %s2068_s14   ;;  %s2068_s14 = sphi %s2105_s14, %s21_s14   ;;  %s2064_s13 = sphi %s2103_s13, %s3651_s13   ;;  %s2060_s12 = sphi %s2101_s12, %s3650_s12   ;;  %s2056_s11 = sphi %s2099_s11, %s3649_s11   ;;  %s2052_s10 = sphi %s2097_s10, %s3648_s10   ;;  %s2048_s9 = sphi %s2095_s9, %s3647_s9  }
   0x9   : > { %s33_s17 = sadd.s32 1, %s2064_s13  ;;  %s42_s18 = sadd.s32 1, %s2056_s11 }
   0xa   : > { %p35_p0 = scmp.ge.s32.totalorder %s33_s17, 2  ;;  %p49_p1 = scmp.ne.s32.totalorder %s2056_s11, %s2052_s10 }
   0xb   : > { %p50_p2 = scmp.eq.s32.totalorder %s2068_s14, 0  ;;  %p55_p3 = scmp.ne.s32.totalorder %s2052_s10, %s2048_s9 }
   0xc   : > { %s3653_s17 = smov (%p35_p0, %s33_s17), 0  ;;  %p56_p5 = scmp.eq.s32.totalorder %s1744_s15, 0 }
   0xd   : > { %p2136_p4 = por %p50_p2, %p49_p1  ;;  %s37_s20 = ssub.s32 %s2064_s13, %s3653_s17 }
   0xe   : > { %p109_p6 = scmp.eq.s32.totalorder %s1744_s15, 1  ;;  %p40_p7 = scmp.eq.s32.totalorder %s37_s20, 0 }
   0xf   : > { %p2142_p8 = por %p56_p5, %p55_p3  ;;  %p115_p10 = scmp.eq.s32.totalorder %s1745_s16, 1 }
  0x10   : > { %p2146_p9 = por %p109_p6, %p49_p1  ;;  %p1845_p13 = scmp.lt.s32.totalorder %s2068_s14, 2 }
  0x11   : > { %s3633_s21 = scalar_select %p2142_p8, 1, 0 }
  0x12   : > { %s3634_s22 = scalar_select %p2146_p9, 1, 0 }
  0x13   : > { %s2151_s23 = scalar_select %p40_p7, %s2056_s11, %s42_s18  }
  0x14   : > { %p2153_p11 = por %p115_p10, %p55_p3  ;;  %s2160_s25 = sand.u32 1, %s2056_s11  }
  0x15   : > { %s1748_s26 = sshll.u32 %s2160_s25, 7  ;;  %s1825_s27 = sshll.u32 %s2064_s13, 11 }
  0x16   : > { %s3635_s24 = scalar_select %p2153_p11, 1, 0 }
  0x17   : > { %s2167_s30 = scalar_lea.hbm %s3623_s0, %s1825_s27  ;;  %s139_s3 = scalar_lea.vmem [#allocation2], %s1748_s26 }
  0x18   : > { %s148_s4 = sshll.u32 %s139_s3, 4  ;;  %p2173_p0 = pnand %p1845_p13, %p2136_p4  ;;  %s2169_s4 = int_to_ptr.vmem [resolvable:$true] %s148_s4 }
  0x19   : > { %s136_s6 = scalar_lea.sflag [#allocation3], %s2160_s25  ;;  %s1922_s7 = scalar_lea.hbm %s2167_s30, 2048 }
  0x1a   : > { %p1923_p2 = scmp.ne.s32.totalorder %s2167_s30, %s1922_s7  ;;  %p1924_p3 = pneg %p2173_p0 }
  0x1b   : > { %s1927_s16 = scalar_lea.hbm %s3623_s0, 4096  ;;  %p1928_p4 = scmp.lt.u32.totalorder %s2167_s30, %s3623_s0 }
  0x1c   : > { %p1925_p5 = pnand %p1924_p3, %p1923_p2  ;;  %p1929_p7 = scmp.lt.u32.totalorder %s1927_s16, %s1922_s7 }
  0x1d   : > { %p1931_p13 = scmp.lt.u32.totalorder %s1922_s7, %s2167_s30 }
  0x1e   : > { %p1926_p6 = pneg %p1925_p5  ;;  %p1930_p10 = por %p1929_p7, %p1928_p4 }
  0x20   : > { %p1932_p12 = por %p1931_p13, %p1930_p10 }
  0x22   : > { %p1933_p1 = pnand %p1932_p12, %p1926_p6 }
  0x24   : > { %1936 = shalt.err (!%p1933_p1)
}
  0x25   : > { %s1937_s20 = scalar_lea.vmem %s2169_s4, 2048  ;;  %s2070_s26 = smov [#allocation2]  }
  0x26   : > { %p1938_p2 = scmp.ne.s32.totalorder %s2169_s4, %s1937_s20  ;;  %s1942_s27 = sshll.u32 %s2070_s26, 4  ;;  %s1943_s27 = int_to_ptr.vmem [resolvable:$false] %s1942_s27 }
  0x27   : > { %s1944_s28 = scalar_lea.vmem %s1943_s27, 4096  ;;  %p1945_p9 = scmp.lt.s32.totalorder %s2169_s4, %s1943_s27 }
  0x28   : > { %p1940_p5 = pnand %p1938_p2, %p1924_p3  ;;  %p1946_p4 = scmp.lt.s32.totalorder %s1944_s28, %s1937_s20 }
  0x2a   : > { %p1941_p11 = pneg %p1940_p5  ;;  %p1947_p7 = por %p1946_p4, %p1945_p9 }
  0x2c   : > { %p1948_p10 = pnand %p1947_p7, %p1941_p11 }
  0x2e   : > { %1951 = shalt.err (!%p1948_p10)
}
  0x2f   : > { %s2071_s29 = smov 128   ;;  %s2072_s3 = smov 8  }
  0x30   : > { %1837 = dma.hbm_to_vmem [thread:$0]  (!%p2173_p0), %s2167_s30, 2048, %s2169_s4, %s136_s6, %s2071_s29, %s2071_s29, %s2072_s3  }
  0x31   : > { %p179_p9 = scmp.lt.s32.totalorder %s2068_s14, 3  ;;  %s1751_s7 = sshll.u32 %s2160_s25, 9 }
  0x32   : > { %s1826_s8 = sshll.u32 %s2064_s13, 13  ;;  %p3637_p11 = scmp.ge.s32.totalorder %s2068_s14, 1 }
  0x33   : > { %s2221_s19 = scalar_lea.hbm %s3624_s1, %s1826_s8  ;;  %s162_s20 = scalar_lea.vmem [#allocation5], %s1751_s7 }
  0x34   : > { %p2214_p12 = pnand %p3637_p11, %p179_p9  ;;  %s171_s26 = sshll.u32 %s162_s20, 4  ;;  %s2223_s26 = int_to_ptr.vmem [resolvable:$true] %s171_s26 }
  0x35   : > { %s159_s30 = scalar_lea.sflag [#allocation6], %s2160_s25  ;;  %s1952_s4 = scalar_lea.hbm %s2221_s19, 8192 }
  0x36   : > { %p1953_p1 = scmp.ne.s32.totalorder %s2221_s19, %s1952_s4  ;;  %s1957_s28 = scalar_lea.hbm %s3624_s1, 16384 }
  0x37   : > { %p1958_p2 = scmp.lt.u32.totalorder %s2221_s19, %s3624_s1  ;;  %p1959_p5 = scmp.lt.u32.totalorder %s1957_s28, %s1952_s4 }
  0x38   : > { %p1955_p6 = pnand %p1953_p1, %p1924_p3  ;;  %p1961_p7 = scmp.lt.u32.totalorder %s1952_s4, %s2221_s19 }
  0x39   : > { %p1960_p4 = por %p1959_p5, %p1958_p2 }
  0x3a   : > { %p1956_p13 = pneg %p1955_p6 }
  0x3b   : > { %p1962_p10 = por %p1961_p7, %p1960_p4 }
  0x3d   : > { %p1963_p9 = pnand %p1962_p10, %p1956_p13 }
  0x3f   : > { %1966 = shalt.err (!%p1963_p9)
}
  0x40   : > { %s1967_s7 = scalar_lea.vmem %s2223_s26, 8192  ;;  %s2073_s18 = smov [#allocation5]  }
  0x41   : > { %p1968_p11 = scmp.ne.s32.totalorder %s2223_s26, %s1967_s7  ;;  %s1972_s20 = sshll.u32 %s2073_s18, 4  ;;  %s1973_s20 = int_to_ptr.vmem [resolvable:$false] %s1972_s20 }
  0x42   : > { %s1974_s6 = scalar_lea.vmem %s1973_s20, 16384  ;;  %p1975_p8 = scmp.lt.s32.totalorder %s2223_s26, %s1973_s20 }
  0x43   : > { %p1970_p1 = pnand %p1968_p11, %p1924_p3  ;;  %p1976_p2 = scmp.lt.s32.totalorder %s1974_s6, %s1967_s7 }
  0x45   : > { %p1971_p6 = pneg %p1970_p1  ;;  %p1977_p5 = por %p1976_p2, %p1975_p8 }
  0x47   : > { %p1978_p4 = pnand %p1977_p5, %p1971_p6 }
  0x49   : > { %1981 = shalt.err (!%p1978_p4)
}
  0x4a   : > { %1840 = dma.hbm_to_vmem [thread:$0]  (!%p2173_p0), %s2221_s19, 8192, %s2223_s26, %s159_s30, %s2071_s29, %s2071_s29, %s2072_s3  }
  0x4b   : > { %183 = sbr.rel (%p2214_p12) target bundleno = 987 (0x3db), region = 28 }
  0x52   : > { %s2257_s4 = sand.u32 1, %s2052_s10   ;;  %p3639_p8 = scmp.ne.s32.totalorder %s3633_s21, 0 }
  0x53   : > { %s1755_s27 = sshll.u32 %s2257_s4, 7  ;;  %s186_s5 = scalar_lea.sflag [#allocation3], %s2257_s4 }
  0x54   : > { %s2263_s28 = scalar_lea.vmem [#allocation2], %s1755_s27 }
  0x55   : > { %2035 = dma.done.wait (%p3639_p8), %s186_s5, 2048  }
  0x56   : > { %2037 = vsyncadd (%p3639_p8), %s186_s5, 4294965248  ;;  %s1756_s25 = sshll.u32 %s2257_s4, 9  ;;  %s195_s29 = scalar_lea.sflag [#allocation6], %s2257_s4 }
  0x57   : > { %s2271_s3 = scalar_lea.vmem [#allocation5], %s1756_s25 }
  0x58   : > { %2039 = dma.done.wait (%p3639_p8), %s195_s29, 8192  }
  0x59   : > { %2041 = vsyncadd (%p3639_p8), %s195_s29, 4294959104  ;;  %v2278_v0 = vld [vmem:[%s2271_s3] sm:$0xff]  ;;  %v2284_v2 = vld [vmem:[%s2271_s3 + $0x10] sm:$0xff]  ;;  %s2074_s15 = smov 18   ;;  %vm291_vm0 = vcmask 130048   ;;  %s2447_s21 = scalar_lea.vmem [#allocation7], %s1755_s27 }
  0x5a   : > { %v2281_v1 = vld [vmem:[%s2263_s28] sm:$0xff]  ;;  %325 = vrot.lane.b32.xlu0 %v2278_v0, %s2074_s15  ;;  %331 = vrot.lane.b32.xlu1 %v2284_v2, %s2074_s15  ;;  %v2293_v4 = vld [vmem:[%s2263_s28 + $0x10] sm:$0xff]  ;;  %vm324_vm1 = vcmask 1047696   ;;  %s2075_s19 = smov 111   ;;  %s2076_s26 = smov 112  }
  0x5b   : > { %v259_v3 = vsub.f32 %v2281_v1, %v2278_v0  ;;  %v2296_v5 = vld [vmem:[%s2271_s3 + $0x8] sm:$0xff]  ;;  %v261_v6 = vsub.f32 %v2293_v4, %v2284_v2  ;;  %v2304_v8 = vld [vmem:[%s2271_s3 + $0x18] sm:$0xff]  ;;  %v2314_v13 = vld [vmem:[%s2271_s3 + $0x20] sm:$0xff]  ;;  %s1827_s30 = sshll.u32 %s2060_s12, 11  ;;  %s1631_s8 = sshll.u32 %s2447_s21, 4  ;;  %s3570_s8 = int_to_ptr.vmem [resolvable:$true] %s1631_s8 }
  0x5c   : > { %v2301_v7 = vld [vmem:[%s2263_s28 + $0x8] sm:$0xff]  ;;  %v2307_v9 = vld [vmem:[%s2263_s28 + $0x18] sm:$0xff]  ;;  %v2317_v14 = vld [vmem:[%s2263_s28 + $0x20] sm:$0xff]  ;;  %s3568_s18 = scalar_lea.hbm %s3625_s2, %s1827_s30  ;;  %s1616_s12 = scalar_lea.sflag [#allocation4], %s2257_s4 }
  0x5d   : > { %v275_v10 = vand.u32 2147483647, %v259_v3  ;;  %v260_v11 = vsub.f32 %v2301_v7, %v2296_v5  ;;  %v262_v12 = vsub.f32 %v2307_v9, %v2304_v8  ;;  %v277_v15 = vand.u32 2147483647, %v261_v6  ;;  %v2322_v17 = vld [vmem:[%s2271_s3 + $0x28] sm:$0xff]  ;;  %v2328_v19 = vld [vmem:[%s2271_s3 + $0x30] sm:$0xff] }
  0x5e   : > { %v263_v16 = vsub.f32 %v2317_v14, %v2314_v13  ;;  %v2325_v18 = vld [vmem:[%s2263_s28 + $0x28] sm:$0xff]  ;;  %328 = vrot.lane.b32.xlu0 %v2296_v5, %s2074_s15  ;;  %334 = vrot.lane.b32.xlu1 %v2304_v8, %s2074_s15  ;;  %v2338_v24 = vld [vmem:[%s2263_s28 + $0x30] sm:$0xff]  ;;  %s1982_s20 = scalar_lea.vmem %s3570_s8, 2048  ;;  %p3644_p3 = scmp.ne.s32.totalorder %s3634_s22, 0 }
  0x5f   : > { %v292_v20 = vsel %vm291_vm0, %v275_v10, 0.0  ;;  %v276_v21 = vand.u32 2147483647, %v260_v11  ;;  %v278_v22 = vand.u32 2147483647, %v262_v12  ;;  %v264_v23 = vsub.f32 %v2325_v18, %v2322_v17  ;;  %v2344_v28 = vld [vmem:[%s2271_s3 + $0x38] sm:$0xff]  ;;  %p1983_p0 = scmp.ne.s32.totalorder %s3570_s8, %s1982_s20 }
  0x60   : > { %v293_v25 = vsel %vm291_vm0, %v277_v15, 0.0  ;;  %v279_v26 = vand.u32 2147483647, %v263_v16  ;;  %v265_v27 = vsub.f32 %v2338_v24, %v2328_v19  ;;  %v2347_v29 = vld [vmem:[%s2263_s28 + $0x38] sm:$0xff]  ;;  %v2352_v34 = vld [vmem:[%s2271_s3 + $0x40] sm:$0xff]  ;;  %v2361_v40 = vld [vmem:[%s2271_s3 + $0x48] sm:$0xff] }
  0x61   : > { %v294_v30 = vadd.f32 %v293_v25, %v292_v20  ;;  %v307_v31 = vsel %vm291_vm0, %v276_v21, 0.0  ;;  %v308_v32 = vsel %vm291_vm0, %v278_v22, 0.0  ;;  %v280_v33 = vand.u32 2147483647, %v264_v23  ;;  %v2355_v35 = vld [vmem:[%s2263_s28 + $0x40] sm:$0xff]  ;;  %v2364_v41 = vld [vmem:[%s2263_s28 + $0x48] sm:$0xff]  ;;  %p1984_p12 = pnand %p1983_p0, %p3644_p3 }
  0x62   : > { %v309_v36 = vadd.f32 %v308_v32, %v307_v31  ;;  %v295_v37 = vsel %vm291_vm0, %v279_v26, 0.0  ;;  %v281_v38 = vand.u32 2147483647, %v265_v27  ;;  %v266_v39 = vsub.f32 %v2347_v29, %v2344_v28  ;;  %v2367_v42 = vld [vmem:[%s2271_s3 + $0x50] sm:$0xff]  ;;  %337 = vrot.lane.b32.xlu0 %v2314_v13, %s2074_s15  ;;  %340 = vrot.lane.b32.xlu1 %v2322_v17, %s2074_s15  ;;  %v2382_v48 = vld [vmem:[%s2271_s3 + $0x58] sm:$0xff]  ;;  %s2077_s6 = smov [#allocation7]  }
  0x63   : > { %v296_v43 = vadd.f32 %v295_v37, %v294_v30  ;;  %v310_v44 = vsel %vm291_vm0, %v280_v33, 0.0  ;;  %v267_v45 = vsub.f32 %v2355_v35, %v2352_v34  ;;  %v268_v46 = vsub.f32 %v2364_v41, %v2361_v40  ;;  %v2379_v47 = vld [vmem:[%s2263_s28 + $0x50] sm:$0xff]  ;;  %v2388_v53 = vld [vmem:[%s2263_s28 + $0x58] sm:$0xff]  ;;  %v2391_v54 = vld [vmem:[%s2271_s3 + $0x60] sm:$0xff]  ;;  %p1985_p13 = pneg %p1984_p12  ;;  %s1986_s27 = sshll.u32 %s2077_s6, 4  ;;  %s1987_s27 = int_to_ptr.vmem [resolvable:$false] %s1986_s27 }
  0x64   : > { %v311_v49 = vadd.f32 %v310_v44, %v309_v36  ;;  %v297_v50 = vsel %vm291_vm0, %v281_v38, 0.0  ;;  %v282_v51 = vand.u32 2147483647, %v266_v39  ;;  %v269_v52 = vsub.f32 %v2379_v47, %v2367_v42  ;;  %v2394_v55 = vld [vmem:[%s2263_s28 + $0x60] sm:$0xff]  ;;  %v2399_v60 = vld [vmem:[%s2271_s3 + $0x68] sm:$0xff]  ;;  %v2410_v10 = vld [vmem:[%s2271_s3 + $0x70] sm:$0xff]  ;;  %p1989_p7 = scmp.lt.s32.totalorder %s3570_s8, %s1987_s27 }
  0x65   : > { %v298_v56 = vadd.f32 %v297_v50, %v296_v43  ;;  %v283_v57 = vand.u32 2147483647, %v267_v45  ;;  %v284_v58 = vand.u32 2147483647, %v268_v46  ;;  %v270_v59 = vsub.f32 %v2388_v53, %v2382_v48  ;;  %v2402_v61 = vld [vmem:[%s2263_s28 + $0x68] sm:$0xff]  ;;  %v2419_v20 = vld [vmem:[%s2263_s28 + $0x70] sm:$0xff] }
  0x66   : > { %v312_v62 = vsel %vm291_vm0, %v282_v51, 0.0  ;;  %v285_v63 = vand.u32 2147483647, %v269_v52  ;;  %v271_v3 = vsub.f32 %v2394_v55, %v2391_v54  ;;  %v272_v6 = vsub.f32 %v2402_v61, %v2399_v60  ;;  %343 = vrot.lane.b32.xlu0 %v2328_v19, %s2074_s15  ;;  %346 = vrot.lane.b32.xlu1 %v2344_v28, %s2074_s15  ;;  %3640 = vst [vmem:[#allocation11_spill] sm:$0xff] %v2419_v20  ;;  %v2422_v21 = vld [vmem:[%s2271_s3 + $0x78] sm:$0xff]  ;;  %s1988_s5 = scalar_lea.vmem %s1987_s27, 4096 }
  0x67   : > { %v313_v11 = vadd.f32 %v312_v62, %v311_v49  ;;  %v299_v12 = vsel %vm291_vm0, %v283_v57, 0.0  ;;  %v314_v15 = vsel %vm291_vm0, %v284_v58, 0.0  ;;  %v286_v16 = vand.u32 2147483647, %v270_v59  ;;  %v2426_v27 = vld [vmem:[%s2263_s28 + $0x78] sm:$0xff]  ;;  %v2465_v57 = vld [vmem:[%s2271_s3 + $0x88] sm:$0xff]  ;;  %p1990_p10 = scmp.lt.s32.totalorder %s1988_s5, %s1982_s20 }
  0x68   : > { %v300_v22 = vadd.f32 %v299_v12, %v298_v56  ;;  %v301_v23 = vsel %vm291_vm0, %v285_v63, 0.0  ;;  %v287_v25 = vand.u32 2147483647, %v271_v3  ;;  %v288_v26 = vand.u32 2147483647, %v272_v6  ;;  %3641 = vst [vmem:[#allocation12_spill] sm:$0xff] %v2426_v27 }
  0x69   : > { %v315_v30 = vadd.f32 %v314_v15, %v313_v11  ;;  %v316_v31 = vsel %vm291_vm0, %v286_v16, 0.0  ;;  %v273_v32 = vsub.f32 %v2419_v20, %v2410_v10  ;;  %v274_v33 = vsub.f32 %v2426_v27, %v2422_v21  ;;  %v2462_v56 = vld [vmem:[%s2271_s3 + $0x80] sm:$0xff]  ;;  %v2472_v58 = vld [vmem:[%s2271_s3 + $0x90] sm:$0xff]  ;;  %v2475_v59 = vld [vmem:[%s2271_s3 + $0x98] sm:$0xff]  ;;  %p1991_p9 = por %p1990_p10, %p1989_p7 }
  0x6a   : > { %v302_v36 = vadd.f32 %v301_v23, %v300_v22  ;;  %v303_v37 = vsel %vm291_vm0, %v287_v25, 0.0  ;;  %v318_v38 = vsel %vm291_vm0, %v288_v26, 0.0  ;;  %349 = vrot.lane.b32.xlu0 %v2352_v34, %s2074_s15  ;;  %352 = vrot.lane.b32.xlu1 %v2361_v40, %s2074_s15  ;;  %v2482_v62 = vld [vmem:[%s2271_s3 + $0xa0] sm:$0xff]  ;;  %v2485_v63 = vld [vmem:[%s2271_s3 + $0xa8] sm:$0xff] }
  0x6b   : > { %v317_v39 = vadd.f32 %v316_v31, %v315_v30  ;;  %v289_v43 = vand.u32 2147483647, %v273_v32  ;;  %v290_v44 = vand.u32 2147483647, %v274_v33  ;;  %v2492_v3 = vld [vmem:[%s2271_s3 + $0xb0] sm:$0xff]  ;;  %v2495_v6 = vld [vmem:[%s2271_s3 + $0xb8] sm:$0xff]  ;;  %p1992_p11 = pnand %p1991_p9, %p1985_p13 }
  0x6c   : > { %v304_v45 = vadd.f32 %v303_v37, %v302_v36  ;;  %v2502_v11 = vld [vmem:[%s2271_s3 + $0xc0] sm:$0xff]  ;;  %v2505_v12 = vld [vmem:[%s2271_s3 + $0xc8] sm:$0xff]  ;;  %v2512_v15 = vld [vmem:[%s2271_s3 + $0xd0] sm:$0xff] }
  0x6d   : > { %v319_v46 = vadd.f32 %v318_v38, %v317_v39  ;;  %v305_v49 = vsel %vm291_vm0, %v289_v43, 0.0  ;;  %v320_v50 = vsel %vm291_vm0, %v290_v44, 0.0  ;;  %v2515_v16 = vld [vmem:[%s2271_s3 + $0xd8] sm:$0xff]  ;;  %v2522_v22 = vld [vmem:[%s2271_s3 + $0xe0] sm:$0xff]  ;;  %v2525_v23 = vld [vmem:[%s2271_s3 + $0xe8] sm:$0xff] }
  0x6e   : > { %v306_v51 = vadd.f32 %v305_v49, %v304_v45  ;;  %355 = vrot.lane.b32.xlu0 %v2367_v42, %s2074_s15  ;;  %358 = vrot.lane.b32.xlu1 %v2382_v48, %s2074_s15  ;;  %v2532_v25 = vld [vmem:[%s2271_s3 + $0xf0] sm:$0xff]  ;;  %v2535_v26 = vld [vmem:[%s2271_s3 + $0xf8] sm:$0xff] }
  0x6f   : > { %v321_v52 = vadd.f32 %v320_v50, %v319_v46 }
  0x70   : > { %322 = vst.msk [vmem:[%s2447_s21] sm:$0xff] %vm291_vm0, %v306_v51 }
  0x71   : > { %323 = vst.msk [vmem:[%s2447_s21 + $0x8] sm:$0xff] %vm291_vm0, %v321_v52 }
  0x72   : > { %361 = vrot.lane.b32.xlu0 %v2391_v54, %s2074_s15  ;;  %364 = vrot.lane.b32.xlu1 %v2399_v60, %s2074_s15 }
  0x76   : > { %367 = vrot.lane.b32.xlu0 %v2410_v10, %s2074_s15  ;;  %370 = vrot.lane.b32.xlu1 %v2422_v21, %s2074_s15 }
  0x7a   : > { %567 = vrot.lane.b32.xlu0 %v2462_v56, %s2074_s15  ;;  %570 = vrot.lane.b32.xlu1 %v2465_v57, %s2074_s15 }
  0x7e   : > { %573 = vrot.lane.b32.xlu0 %v2472_v58, %s2074_s15  ;;  %576 = vrot.lane.b32.xlu1 %v2475_v59, %s2074_s15 }
  0x82   : > { %579 = vrot.lane.b32.xlu0 %v2482_v62, %s2074_s15  ;;  %582 = vrot.lane.b32.xlu1 %v2485_v63, %s2074_s15 }
  0x86   : > { %585 = vrot.lane.b32.xlu0 %v2492_v3, %s2074_s15  ;;  %588 = vrot.lane.b32.xlu1 %v2495_v6, %s2074_s15 }
  0x8a   : > { %591 = vrot.lane.b32.xlu0 %v2502_v11, %s2074_s15  ;;  %594 = vrot.lane.b32.xlu1 %v2505_v12, %s2074_s15 }
  0x8e   : > { %597 = vrot.lane.b32.xlu0 %v2512_v15, %s2074_s15  ;;  %600 = vrot.lane.b32.xlu1 %v2515_v16, %s2074_s15 }
  0x92   : > { %603 = vrot.lane.b32.xlu0 %v2522_v22, %s2074_s15  ;;  %606 = vrot.lane.b32.xlu1 %v2525_v23, %s2074_s15 }
  0x96   : > { %609 = vrot.lane.b32.xlu0 %v2532_v25, %s2074_s15  ;;  %612 = vrot.lane.b32.xlu1 %v2535_v26, %s2074_s15 }
  0xcc   : > { %v326_v30 = vpop.permute.xlu0 %325  ;;  %v332_v31 = vpop.permute.xlu1 %331 }
  0xcd   : > { %v327_v32 = vsel %vm324_vm1, %v326_v30, %v2278_v0  ;;  %v333_v33 = vsel %vm324_vm1, %v332_v31, %v2284_v2 }
  0xce   : > { %373 = vrot.lane.b32.xlu0 %v327_v32, %s2074_s15 }
  0xd0   : > { %v329_v36 = vpop.permute.xlu0 %328  ;;  %v335_v37 = vpop.permute.xlu1 %334 }
  0xd1   : > { %v330_v38 = vsel %vm324_vm1, %v329_v36, %v2296_v5  ;;  %v336_v39 = vsel %vm324_vm1, %v335_v37, %v2304_v8 }
  0xd2   : > { %377 = vrot.lane.b32.xlu0 %v333_v33, %s2074_s15  ;;  %375 = vrot.lane.b32.xlu1 %v330_v38, %s2074_s15 }
  0xd4   : > { %v338_v43 = vpop.permute.xlu0 %337  ;;  %v341_v44 = vpop.permute.xlu1 %340 }
  0xd5   : > { %v339_v45 = vsel %vm324_vm1, %v338_v43, %v2314_v13  ;;  %v342_v46 = vsel %vm324_vm1, %v341_v44, %v2322_v17 }
  0xd6   : > { %379 = vrot.lane.b32.xlu1 %v336_v39, %s2074_s15  ;;  %381 = vrot.lane.b32.xlu0 %v339_v45, %s2074_s15 }
  0xd8   : > { %v344_v49 = vpop.permute.xlu0 %343  ;;  %v347_v50 = vpop.permute.xlu1 %346 }
  0xd9   : > { %v345_v51 = vsel %vm324_vm1, %v344_v49, %v2328_v19  ;;  %v348_v52 = vsel %vm324_vm1, %v347_v50, %v2344_v28 }
  0xda   : > { %383 = vrot.lane.b32.xlu1 %v342_v46, %s2074_s15  ;;  %385 = vrot.lane.b32.xlu0 %v345_v51, %s2074_s15 }
  0xdc   : > { %v350_v30 = vpop.permute.xlu0 %349  ;;  %v353_v31 = vpop.permute.xlu1 %352 }
  0xdd   : > { %v351_v32 = vsel %vm324_vm1, %v350_v30, %v2352_v34  ;;  %v354_v33 = vsel %vm324_vm1, %v353_v31, %v2361_v40 }
  0xde   : > { %387 = vrot.lane.b32.xlu1 %v348_v52, %s2074_s15  ;;  %389 = vrot.lane.b32.xlu0 %v351_v32, %s2074_s15 }
  0xe0   : > { %v356_v36 = vpop.permute.xlu0 %355  ;;  %v359_v37 = vpop.permute.xlu1 %358 }
  0xe1   : > { %v357_v38 = vsel %vm324_vm1, %v356_v36, %v2367_v42  ;;  %v360_v39 = vsel %vm324_vm1, %v359_v37, %v2382_v48 }
  0xe2   : > { %391 = vrot.lane.b32.xlu1 %v354_v33, %s2074_s15  ;;  %393 = vrot.lane.b32.xlu0 %v357_v38, %s2074_s15 }
  0xe4   : > { %v362_v43 = vpop.permute.xlu0 %361  ;;  %v365_v44 = vpop.permute.xlu1 %364 }
  0xe5   : > { %v363_v45 = vsel %vm324_vm1, %v362_v43, %v2391_v54  ;;  %v366_v46 = vsel %vm324_vm1, %v365_v44, %v2399_v60 }
  0xe6   : > { %395 = vrot.lane.b32.xlu1 %v360_v39, %s2074_s15  ;;  %397 = vrot.lane.b32.xlu0 %v363_v45, %s2074_s15 }
  0xe8   : > { %v368_v49 = vpop.permute.xlu0 %367  ;;  %v371_v50 = vpop.permute.xlu1 %370 }
  0xe9   : > { %v369_v51 = vsel %vm324_vm1, %v368_v49, %v2410_v10  ;;  %v372_v52 = vsel %vm324_vm1, %v371_v50, %v2422_v21 }
  0xea   : > { %399 = vrot.lane.b32.xlu1 %v366_v46, %s2074_s15  ;;  %401 = vrot.lane.b32.xlu0 %v369_v51, %s2074_s15 }
  0xec   : > { %v568_v30 = vpop.permute.xlu0 %567  ;;  %v571_v31 = vpop.permute.xlu1 %570 }
  0xed   : > { %v569_v32 = vsel %vm324_vm1, %v568_v30, %v2462_v56  ;;  %v572_v33 = vsel %vm324_vm1, %v571_v31, %v2465_v57 }
  0xee   : > { %403 = vrot.lane.b32.xlu1 %v372_v52, %s2074_s15  ;;  %615 = vrot.lane.b32.xlu0 %v569_v32, %s2074_s15 }
  0xf0   : > { %v574_v36 = vpop.permute.xlu0 %573  ;;  %v577_v37 = vpop.permute.xlu1 %576 }
  0xf1   : > { %v575_v38 = vsel %vm324_vm1, %v574_v36, %v2472_v58  ;;  %v578_v39 = vsel %vm324_vm1, %v577_v37, %v2475_v59 }
  0xf2   : > { %617 = vrot.lane.b32.xlu1 %v572_v33, %s2074_s15  ;;  %619 = vrot.lane.b32.xlu0 %v575_v38, %s2074_s15 }
  0xf4   : > { %v580_v43 = vpop.permute.xlu0 %579  ;;  %v583_v44 = vpop.permute.xlu1 %582 }
  0xf5   : > { %v581_v45 = vsel %vm324_vm1, %v580_v43, %v2482_v62  ;;  %v584_v46 = vsel %vm324_vm1, %v583_v44, %v2485_v63 }
  0xf6   : > { %621 = vrot.lane.b32.xlu1 %v578_v39, %s2074_s15  ;;  %623 = vrot.lane.b32.xlu0 %v581_v45, %s2074_s15 }
  0xf8   : > { %v586_v49 = vpop.permute.xlu0 %585  ;;  %v589_v50 = vpop.permute.xlu1 %588 }
  0xf9   : > { %v587_v51 = vsel %vm324_vm1, %v586_v49, %v2492_v3  ;;  %v590_v52 = vsel %vm324_vm1, %v589_v50, %v2495_v6 }
  0xfa   : > { %625 = vrot.lane.b32.xlu1 %v584_v46, %s2074_s15  ;;  %627 = vrot.lane.b32.xlu0 %v587_v51, %s2074_s15 }
  0xfc   : > { %v592_v30 = vpop.permute.xlu0 %591  ;;  %v595_v31 = vpop.permute.xlu1 %594 }
  0xfd   : > { %v593_v32 = vsel %vm324_vm1, %v592_v30, %v2502_v11  ;;  %v596_v33 = vsel %vm324_vm1, %v595_v31, %v2505_v12  ;;  %v2637_v30 = vld [vmem:[%s2271_s3 + $0x100] sm:$0xff]  ;;  %v2643_v31 = vld [vmem:[%s2271_s3 + $0x108] sm:$0xff] }
  0xfe   : > { %629 = vrot.lane.b32.xlu1 %v590_v52, %s2074_s15  ;;  %631 = vrot.lane.b32.xlu0 %v593_v32, %s2074_s15  ;;  %v2646_v32 = vld [vmem:[%s2271_s3 + $0x110] sm:$0xff] }
 0x100   : > { %v598_v36 = vpop.permute.xlu0 %597  ;;  %v601_v37 = vpop.permute.xlu1 %600 }
 0x101   : > { %v599_v38 = vsel %vm324_vm1, %v598_v36, %v2512_v15  ;;  %v602_v39 = vsel %vm324_vm1, %v601_v37, %v2515_v16  ;;  %v2656_v36 = vld [vmem:[%s2271_s3 + $0x120] sm:$0xff]  ;;  %v2663_v37 = vld [vmem:[%s2271_s3 + $0x128] sm:$0xff] }
 0x102   : > { %633 = vrot.lane.b32.xlu1 %v596_v33, %s2074_s15  ;;  %635 = vrot.lane.b32.xlu0 %v599_v38, %s2074_s15  ;;  %v2653_v33 = vld [vmem:[%s2271_s3 + $0x118] sm:$0xff]  ;;  %v2666_v38 = vld [vmem:[%s2271_s3 + $0x130] sm:$0xff] }
 0x104   : > { %v604_v43 = vpop.permute.xlu0 %603  ;;  %v607_v44 = vpop.permute.xlu1 %606 }
 0x105   : > { %v605_v45 = vsel %vm324_vm1, %v604_v43, %v2522_v22  ;;  %v608_v46 = vsel %vm324_vm1, %v607_v44, %v2525_v23  ;;  %v2676_v43 = vld [vmem:[%s2271_s3 + $0x140] sm:$0xff]  ;;  %v2683_v44 = vld [vmem:[%s2271_s3 + $0x148] sm:$0xff] }
 0x106   : > { %637 = vrot.lane.b32.xlu1 %v602_v39, %s2074_s15  ;;  %639 = vrot.lane.b32.xlu0 %v605_v45, %s2074_s15  ;;  %v2673_v39 = vld [vmem:[%s2271_s3 + $0x138] sm:$0xff] }
 0x108   : > { %v610_v49 = vpop.permute.xlu0 %609  ;;  %v613_v50 = vpop.permute.xlu1 %612 }
 0x109   : > { %v611_v51 = vsel %vm324_vm1, %v610_v49, %v2532_v25  ;;  %v614_v52 = vsel %vm324_vm1, %v613_v50, %v2535_v26 }
 0x10a   : > { %641 = vrot.lane.b32.xlu1 %v608_v46, %s2074_s15  ;;  %643 = vrot.lane.b32.xlu0 %v611_v51, %s2074_s15 }
 0x10e   : > { %645 = vrot.lane.b32.xlu1 %v614_v52, %s2074_s15  ;;  %922 = vrot.lane.b32.xlu0 %v2637_v30, %s2074_s15 }
 0x112   : > { %925 = vrot.lane.b32.xlu1 %v2643_v31, %s2074_s15  ;;  %928 = vrot.lane.b32.xlu0 %v2646_v32, %s2074_s15 }
 0x116   : > { %931 = vrot.lane.b32.xlu1 %v2653_v33, %s2074_s15  ;;  %934 = vrot.lane.b32.xlu0 %v2656_v36, %s2074_s15 }
 0x11a   : > { %937 = vrot.lane.b32.xlu1 %v2663_v37, %s2074_s15  ;;  %940 = vrot.lane.b32.xlu0 %v2666_v38, %s2074_s15 }
 0x11e   : > { %943 = vrot.lane.b32.xlu1 %v2673_v39, %s2074_s15  ;;  %946 = vrot.lane.b32.xlu0 %v2676_v43, %s2074_s15 }
 0x122   : > { %949 = vrot.lane.b32.xlu1 %v2683_v44, %s2074_s15 }
 0x140   : > { %v374_v45 = vpop.permute.xlu0 %373 }
 0x141   : > { %v405_v46 = vsel %vm324_vm1, %v374_v45, %v2278_v0 }
 0x142   : > { %437 = vrot.lane.b32.xlu0 %v405_v46, %s2075_s19 }
 0x144   : > { %v376_v49 = vpop.permute.xlu1 %375  ;;  %v378_v50 = vpop.permute.xlu0 %377 }
 0x145   : > { %v406_v51 = vsel %vm324_vm1, %v376_v49, %v2296_v5  ;;  %v407_v52 = vsel %vm324_vm1, %v378_v50, %v2284_v2 }
 0x146   : > { %439 = vrot.lane.b32.xlu1 %v406_v51, %s2075_s19  ;;  %441 = vrot.lane.b32.xlu0 %v407_v52, %s2075_s19 }
 0x148   : > { %v380_v27 = vpop.permute.xlu1 %379  ;;  %v382_v20 = vpop.permute.xlu0 %381 }
 0x149   : > { %v408_v0 = vsel %vm324_vm1, %v380_v27, %v2304_v8  ;;  %v409_v45 = vsel %vm324_vm1, %v382_v20, %v2314_v13 }
 0x14a   : > { %443 = vrot.lane.b32.xlu1 %v408_v0, %s2075_s19  ;;  %445 = vrot.lane.b32.xlu0 %v409_v45, %s2075_s19 }
 0x14c   : > { %v384_v5 = vpop.permute.xlu1 %383  ;;  %v386_v46 = vpop.permute.xlu0 %385 }
 0x14d   : > { %v410_v2 = vsel %vm324_vm1, %v384_v5, %v2322_v17  ;;  %v411_v49 = vsel %vm324_vm1, %v386_v46, %v2328_v19 }
 0x14e   : > { %447 = vrot.lane.b32.xlu1 %v410_v2, %s2075_s19  ;;  %449 = vrot.lane.b32.xlu0 %v411_v49, %s2075_s19 }
 0x150   : > { %v388_v8 = vpop.permute.xlu1 %387  ;;  %v390_v27 = vpop.permute.xlu0 %389 }
 0x151   : > { %v412_v13 = vsel %vm324_vm1, %v388_v8, %v2344_v28  ;;  %v413_v20 = vsel %vm324_vm1, %v390_v27, %v2352_v34 }
 0x152   : > { %451 = vrot.lane.b32.xlu1 %v412_v13, %s2075_s19  ;;  %453 = vrot.lane.b32.xlu0 %v413_v20, %s2075_s19 }
 0x154   : > { %v392_v17 = vpop.permute.xlu1 %391  ;;  %v394_v50 = vpop.permute.xlu0 %393 }
 0x155   : > { %v414_v19 = vsel %vm324_vm1, %v392_v17, %v2361_v40  ;;  %v415_v51 = vsel %vm324_vm1, %v394_v50, %v2367_v42 }
 0x156   : > { %455 = vrot.lane.b32.xlu1 %v414_v19, %s2075_s19  ;;  %457 = vrot.lane.b32.xlu0 %v415_v51, %s2075_s19 }
 0x158   : > { %v396_v28 = vpop.permute.xlu1 %395  ;;  %v398_v52 = vpop.permute.xlu0 %397 }
 0x159   : > { %v416_v34 = vsel %vm324_vm1, %v396_v28, %v2382_v48  ;;  %v417_v0 = vsel %vm324_vm1, %v398_v52, %v2391_v54 }
 0x15a   : > { %459 = vrot.lane.b32.xlu1 %v416_v34, %s2075_s19  ;;  %461 = vrot.lane.b32.xlu0 %v417_v0, %s2075_s19 }
 0x15c   : > { %v400_v40 = vpop.permute.xlu1 %399  ;;  %v402_v45 = vpop.permute.xlu0 %401 }
 0x15d   : > { %v418_v42 = vsel %vm324_vm1, %v400_v40, %v2399_v60  ;;  %v419_v5 = vsel %vm324_vm1, %v402_v45, %v2410_v10  ;;  %v2799_v45 = vld [vmem:[%s2271_s3 + $0x150] sm:$0xff] }
 0x15e   : > { %463 = vrot.lane.b32.xlu1 %v418_v42, %s2075_s19  ;;  %465 = vrot.lane.b32.xlu0 %v419_v5, %s2075_s19 }
 0x160   : > { %v404_v48 = vpop.permute.xlu1 %403  ;;  %v616_v46 = vpop.permute.xlu0 %615 }
 0x161   : > { %v420_v54 = vsel %vm324_vm1, %v404_v48, %v2422_v21  ;;  %v647_v2 = vsel %vm324_vm1, %v616_v46, %v2462_v56  ;;  %v2805_v48 = vld [vmem:[%s2271_s3 + $0x158] sm:$0xff]  ;;  %v2808_v46 = vld [vmem:[%s2271_s3 + $0x160] sm:$0xff] }
 0x162   : > { %467 = vrot.lane.b32.xlu1 %v420_v54, %s2075_s19  ;;  %679 = vrot.lane.b32.xlu0 %v647_v2, %s2075_s19 }
 0x164   : > { %v618_v60 = vpop.permute.xlu1 %617  ;;  %v620_v49 = vpop.permute.xlu0 %619 }
 0x165   : > { %v648_v10 = vsel %vm324_vm1, %v618_v60, %v2465_v57  ;;  %v649_v8 = vsel %vm324_vm1, %v620_v49, %v2472_v58  ;;  %v2818_v60 = vld [vmem:[%s2271_s3 + $0x170] sm:$0xff] }
 0x166   : > { %681 = vrot.lane.b32.xlu1 %v648_v10, %s2075_s19  ;;  %683 = vrot.lane.b32.xlu0 %v649_v8, %s2075_s19 }
 0x168   : > { %v622_v21 = vpop.permute.xlu1 %621  ;;  %v624_v27 = vpop.permute.xlu0 %623 }
 0x169   : > { %v650_v56 = vsel %vm324_vm1, %v622_v21, %v2475_v59  ;;  %v651_v13 = vsel %vm324_vm1, %v624_v27, %v2482_v62 }
 0x16a   : > { %685 = vrot.lane.b32.xlu1 %v650_v56, %s2075_s19  ;;  %687 = vrot.lane.b32.xlu0 %v651_v13, %s2075_s19 }
 0x16c   : > { %v626_v57 = vpop.permute.xlu1 %625  ;;  %v628_v20 = vpop.permute.xlu0 %627 }
 0x16d   : > { %v652_v58 = vsel %vm324_vm1, %v626_v57, %v2485_v63  ;;  %v653_v17 = vsel %vm324_vm1, %v628_v20, %v2492_v3 }
 0x16e   : > { %689 = vrot.lane.b32.xlu1 %v652_v58, %s2075_s19  ;;  %691 = vrot.lane.b32.xlu0 %v653_v17, %s2075_s19 }
 0x170   : > { %v630_v59 = vpop.permute.xlu1 %629  ;;  %v632_v50 = vpop.permute.xlu0 %631 }
 0x171   : > { %v655_v62 = vsel %vm324_vm1, %v632_v50, %v2502_v11  ;;  %v654_v19 = vsel %vm324_vm1, %v630_v59, %v2495_v6 }
 0x172   : > { %693 = vrot.lane.b32.xlu1 %v654_v19, %s2075_s19  ;;  %695 = vrot.lane.b32.xlu0 %v655_v62, %s2075_s19 }
 0x174   : > { %v634_v63 = vpop.permute.xlu1 %633  ;;  %v636_v51 = vpop.permute.xlu0 %635 }
 0x175   : > { %v656_v3 = vsel %vm324_vm1, %v634_v63, %v2505_v12  ;;  %v657_v28 = vsel %vm324_vm1, %v636_v51, %v2512_v15 }
 0x176   : > { %697 = vrot.lane.b32.xlu1 %v656_v3, %s2075_s19  ;;  %699 = vrot.lane.b32.xlu0 %v657_v28, %s2075_s19 }
 0x178   : > { %v638_v11 = vpop.permute.xlu1 %637  ;;  %v640_v52 = vpop.permute.xlu0 %639 }
 0x179   : > { %v658_v6 = vsel %vm324_vm1, %v638_v11, %v2515_v16  ;;  %v659_v34 = vsel %vm324_vm1, %v640_v52, %v2522_v22 }
 0x17a   : > { %701 = vrot.lane.b32.xlu1 %v658_v6, %s2075_s19  ;;  %703 = vrot.lane.b32.xlu0 %v659_v34, %s2075_s19 }
 0x17c   : > { %v642_v12 = vpop.permute.xlu1 %641  ;;  %v644_v0 = vpop.permute.xlu0 %643 }
 0x17d   : > { %v660_v15 = vsel %vm324_vm1, %v642_v12, %v2525_v23  ;;  %v661_v40 = vsel %vm324_vm1, %v644_v0, %v2532_v25 }
 0x17e   : > { %705 = vrot.lane.b32.xlu1 %v660_v15, %s2075_s19  ;;  %707 = vrot.lane.b32.xlu0 %v661_v40, %s2075_s19 }
 0x180   : > { %v646_v16 = vpop.permute.xlu1 %645  ;;  %v923_v23 = vpop.permute.xlu0 %922 }
 0x181   : > { %v662_v22 = vsel %vm324_vm1, %v646_v16, %v2535_v26  ;;  %v924_v21 = vsel %vm324_vm1, %v923_v23, %v2637_v30 }
 0x182   : > { %709 = vrot.lane.b32.xlu1 %v662_v22, %s2075_s19  ;;  %792 = vrot.lane.b32.xlu0 %v647_v2, %s2076_s26  ;;  %v2815_v2 = vld [vmem:[%s2271_s3 + $0x168] sm:$0xff] }
 0x184   : > { %v926_v25 = vpop.permute.xlu1 %925  ;;  %v929_v26 = vpop.permute.xlu0 %928 }
 0x186   : > { %794 = vrot.lane.b32.xlu1 %v648_v10, %s2076_s26  ;;  %796 = vrot.lane.b32.xlu0 %v649_v8, %s2076_s26  ;;  %v2825_v10 = vld [vmem:[%s2271_s3 + $0x178] sm:$0xff] }
 0x188   : > { %v932_v42 = vpop.permute.xlu1 %931  ;;  %v935_v5 = vpop.permute.xlu0 %934 }
 0x18a   : > { %798 = vrot.lane.b32.xlu1 %v650_v56, %s2076_s26  ;;  %800 = vrot.lane.b32.xlu0 %v651_v13, %s2076_s26  ;;  %v927_v56 = vsel %vm324_vm1, %v926_v25, %v2643_v31  ;;  %v930_v13 = vsel %vm324_vm1, %v929_v26, %v2646_v32 }
 0x18c   : > { %v938_v54 = vpop.permute.xlu1 %937  ;;  %v941_v49 = vpop.permute.xlu0 %940 }
 0x18e   : > { %802 = vrot.lane.b32.xlu1 %v652_v58, %s2076_s26  ;;  %804 = vrot.lane.b32.xlu0 %v653_v17, %s2076_s26  ;;  %v933_v58 = vsel %vm324_vm1, %v932_v42, %v2653_v33  ;;  %v936_v17 = vsel %vm324_vm1, %v935_v5, %v2656_v36 }
 0x190   : > { %v944_v8 = vpop.permute.xlu1 %943  ;;  %v947_v27 = vpop.permute.xlu0 %946 }
 0x192   : > { %806 = vrot.lane.b32.xlu1 %v654_v19, %s2076_s26  ;;  %808 = vrot.lane.b32.xlu0 %v655_v62, %s2076_s26  ;;  %v939_v62 = vsel %vm324_vm1, %v938_v54, %v2663_v37  ;;  %v942_v19 = vsel %vm324_vm1, %v941_v49, %v2666_v38 }
 0x194   : > { %v950_v57 = vpop.permute.xlu1 %949 }
 0x195   : > { %v951_v12 = vsel %vm324_vm1, %v950_v57, %v2683_v44 }
 0x196   : > { %810 = vrot.lane.b32.xlu1 %v656_v3, %s2076_s26  ;;  %812 = vrot.lane.b32.xlu0 %v657_v28, %s2076_s26  ;;  %v945_v3 = vsel %vm324_vm1, %v944_v8, %v2673_v39  ;;  %v948_v28 = vsel %vm324_vm1, %v947_v27, %v2676_v43 }
 0x19a   : > { %814 = vrot.lane.b32.xlu1 %v658_v6, %s2076_s26  ;;  %816 = vrot.lane.b32.xlu0 %v659_v34, %s2076_s26 }
 0x19e   : > { %818 = vrot.lane.b32.xlu1 %v660_v15, %s2076_s26  ;;  %820 = vrot.lane.b32.xlu0 %v661_v40, %s2076_s26 }
 0x1a2   : > { %822 = vrot.lane.b32.xlu1 %v662_v22, %s2076_s26  ;;  %952 = vrot.lane.b32.xlu0 %v2799_v45, %s2074_s15 }
 0x1a6   : > { %955 = vrot.lane.b32.xlu1 %v2805_v48, %s2074_s15  ;;  %958 = vrot.lane.b32.xlu0 %v2808_v46, %s2074_s15 }
 0x1aa   : > { %961 = vrot.lane.b32.xlu1 %v2815_v2, %s2074_s15  ;;  %964 = vrot.lane.b32.xlu0 %v2818_v60, %s2074_s15 }
 0x1ae   : > { %967 = vrot.lane.b32.xlu1 %v2825_v10, %s2074_s15  ;;  %970 = vrot.lane.b32.xlu0 %v924_v21, %s2074_s15 }
 0x1b2   : > { %972 = vrot.lane.b32.xlu1 %v927_v56, %s2074_s15  ;;  %974 = vrot.lane.b32.xlu0 %v930_v13, %s2074_s15 }
 0x1b4   : > { %v438_v20 = vpop.permute.xlu0 %437 }
 0x1b5   : > { %v485_v52 = vsub.f32 %v2281_v1, %v438_v20 }
 0x1b6   : > { %976 = vrot.lane.b32.xlu1 %v933_v58, %s2074_s15  ;;  %978 = vrot.lane.b32.xlu0 %v936_v17, %s2074_s15 }
 0x1b7   : > { %v501_v22 = vand.u32 2147483647, %v485_v52 }
 0x1b8   : > { %v440_v59 = vpop.permute.xlu1 %439  ;;  %v442_v50 = vpop.permute.xlu0 %441 }
 0x1b9   : > { %v487_v11 = vsub.f32 %v2293_v4, %v442_v50  ;;  %v486_v23 = vsub.f32 %v2301_v7, %v440_v59  ;;  %v517_v56 = vsel %vm291_vm0, %v501_v22, 0.0 }
 0x1ba   : > { %980 = vrot.lane.b32.xlu1 %v939_v62, %s2074_s15  ;;  %982 = vrot.lane.b32.xlu0 %v942_v19, %s2074_s15 }
 0x1bb   : > { %v503_v15 = vand.u32 2147483647, %v487_v11  ;;  %v502_v13 = vand.u32 2147483647, %v486_v23 }
 0x1bc   : > { %v444_v63 = vpop.permute.xlu1 %443  ;;  %v446_v51 = vpop.permute.xlu0 %445 }
 0x1bd   : > { %v489_v0 = vsub.f32 %v2317_v14, %v446_v51  ;;  %v488_v40 = vsub.f32 %v2307_v9, %v444_v63  ;;  %v518_v49 = vsel %vm291_vm0, %v503_v15, 0.0  ;;  %v532_v11 = vsel %vm291_vm0, %v502_v13, 0.0 }
 0x1be   : > { %984 = vrot.lane.b32.xlu1 %v945_v3, %s2074_s15  ;;  %986 = vrot.lane.b32.xlu0 %v948_v28, %s2074_s15  ;;  %v519_v19 = vadd.f32 %v518_v49, %v517_v56 }
 0x1bf   : > { %v505_v5 = vand.u32 2147483647, %v489_v0  ;;  %v504_v8 = vand.u32 2147483647, %v488_v40 }
 0x1c0   : > { %v448_v6 = vpop.permute.xlu1 %447  ;;  %v450_v34 = vpop.permute.xlu0 %449 }
 0x1c1   : > { %v491_v16 = vsub.f32 %v2338_v24, %v450_v34  ;;  %v490_v25 = vsub.f32 %v2325_v18, %v448_v6  ;;  %v520_v17 = vsel %vm291_vm0, %v505_v5, 0.0  ;;  %v533_v63 = vsel %vm291_vm0, %v504_v8, 0.0 }
 0x1c2   : > { %988 = vrot.lane.b32.xlu1 %v951_v12, %s2074_s15  ;;  %v521_v52 = vadd.f32 %v520_v17, %v519_v19  ;;  %v534_v22 = vadd.f32 %v533_v63, %v532_v11 }
 0x1c3   : > { %v507_v21 = vand.u32 2147483647, %v491_v16  ;;  %v506_v57 = vand.u32 2147483647, %v490_v25 }
 0x1c4   : > { %v452_v26 = vpop.permute.xlu1 %451  ;;  %v454_v42 = vpop.permute.xlu0 %453 }
 0x1c5   : > { %v493_v54 = vsub.f32 %v2355_v35, %v454_v42  ;;  %v492_v27 = vsub.f32 %v2347_v29, %v452_v26  ;;  %v522_v51 = vsel %vm291_vm0, %v507_v21, 0.0  ;;  %v535_v6 = vsel %vm291_vm0, %v506_v57, 0.0  ;;  %v3642_v57 = vld [vmem:[#allocation11_spill] sm:$0xff] }
 0x1c6   : > { %v523_v23 = vadd.f32 %v522_v51, %v521_v52  ;;  %v3643_v52 = vld [vmem:[#allocation12_spill] sm:$0xff] }
 0x1c7   : > { %v509_v59 = vand.u32 2147483647, %v493_v54  ;;  %v508_v3 = vand.u32 2147483647, %v492_v27  ;;  %v536_v54 = vadd.f32 %v535_v6, %v534_v22 }
 0x1c8   : > { %v456_v20 = vpop.permute.xlu1 %455  ;;  %v458_v58 = vpop.permute.xlu0 %457 }
 0x1c9   : > { %v494_v50 = vsub.f32 %v2364_v41, %v456_v20  ;;  %v495_v62 = vsub.f32 %v2379_v47, %v458_v58  ;;  %v524_v0 = vsel %vm291_vm0, %v509_v59, 0.0  ;;  %v537_v25 = vsel %vm291_vm0, %v508_v3, 0.0 }
 0x1ca   : > { %v525_v49 = vadd.f32 %v524_v0, %v523_v23  ;;  %v538_v58 = vadd.f32 %v537_v25, %v536_v54 }
 0x1cb   : > { %v511_v28 = vand.u32 2147483647, %v495_v62  ;;  %v510_v15 = vand.u32 2147483647, %v494_v50 }
 0x1cc   : > { %v460_v34 = vpop.permute.xlu1 %459  ;;  %v462_v12 = vpop.permute.xlu0 %461 }
 0x1cd   : > { %v496_v40 = vsub.f32 %v2388_v53, %v460_v34  ;;  %v497_v16 = vsub.f32 %v2394_v55, %v462_v12  ;;  %v526_v26 = vsel %vm291_vm0, %v511_v28, 0.0  ;;  %v539_v27 = vsel %vm291_vm0, %v510_v15, 0.0 }
 0x1ce   : > { %v527_v17 = vadd.f32 %v526_v26, %v525_v49  ;;  %v540_v19 = vadd.f32 %v539_v27, %v538_v58 }
 0x1cf   : > { %v512_v42 = vand.u32 2147483647, %v496_v40  ;;  %v513_v5 = vand.u32 2147483647, %v497_v16 }
 0x1d0   : > { %v464_v8 = vpop.permute.xlu1 %463  ;;  %v466_v21 = vpop.permute.xlu0 %465 }
 0x1d1   : > { %v528_v56 = vsel %vm291_vm0, %v513_v5, 0.0  ;;  %v498_v13 = vsub.f32 %v2402_v61, %v464_v8  ;;  %v499_v20 = vsub.f32 %v3642_v57, %v466_v21  ;;  %v541_v59 = vsel %vm291_vm0, %v512_v42, 0.0 }
 0x1d2   : > { %v529_v63 = vadd.f32 %v528_v56, %v527_v17  ;;  %v542_v34 = vadd.f32 %v541_v59, %v540_v19 }
 0x1d3   : > { %v514_v50 = vand.u32 2147483647, %v498_v13  ;;  %v515_v62 = vand.u32 2147483647, %v499_v20 }
 0x1d4   : > { %v468_v51 = vpop.permute.xlu1 %467  ;;  %v680_v3 = vpop.permute.xlu0 %679 }
 0x1d5   : > { %v543_v28 = vsel %vm291_vm0, %v514_v50, 0.0  ;;  %v530_v11 = vsel %vm291_vm0, %v515_v62, 0.0  ;;  %v500_v6 = vsub.f32 %v3643_v52, %v468_v51  ;;  %v727_v5 = vsub.f32 %v2281_v1, %v680_v3 }
 0x1d6   : > { %v531_v12 = vadd.f32 %v530_v11, %v529_v63  ;;  %v544_v15 = vadd.f32 %v543_v28, %v542_v34 }
 0x1d7   : > { %v516_v0 = vand.u32 2147483647, %v500_v6  ;;  %v743_v13 = vand.u32 2147483647, %v727_v5 }
 0x1d8   : > { %1758 = vst.msk [vmem:[%s2447_s21 + $0x40] sm:$0xff] %vm291_vm0, %v531_v12  ;;  %v682_v40 = vpop.permute.xlu1 %681  ;;  %v684_v16 = vpop.permute.xlu0 %683 }
 0x1d9   : > { %v545_v22 = vsel %vm291_vm0, %v516_v0, 0.0  ;;  %v729_v42 = vsub.f32 %v2293_v4, %v684_v16  ;;  %v728_v20 = vsub.f32 %v2301_v7, %v682_v40 }
 0x1da   : > { %v546_v23 = vadd.f32 %v545_v22, %v544_v15 }
 0x1db   : > { %v745_v21 = vand.u32 2147483647, %v729_v42  ;;  %v744_v63 = vand.u32 2147483647, %v728_v20 }
 0x1dc   : > { %1759 = vst.msk [vmem:[%s2447_s21 + $0x48] sm:$0xff] %vm291_vm0, %v546_v23  ;;  %v686_v25 = vpop.permute.xlu1 %685  ;;  %v688_v26 = vpop.permute.xlu0 %687 }
 0x1dd   : > { %v731_v8 = vsub.f32 %v2317_v14, %v688_v26  ;;  %v730_v27 = vsub.f32 %v2307_v9, %v686_v25  ;;  %v760_v1 = vsel %vm291_vm0, %v745_v21, 0.0  ;;  %v759_v9 = vsel %vm291_vm0, %v743_v13, 0.0 }
 0x1de   : > { %v774_v0 = vsel %vm291_vm0, %v744_v63, 0.0 }
 0x1df   : > { %v747_v50 = vand.u32 2147483647, %v731_v8  ;;  %v746_v62 = vand.u32 2147483647, %v730_v27 }
 0x1e0   : > { %v690_v54 = vpop.permute.xlu1 %689  ;;  %v692_v49 = vpop.permute.xlu0 %691 }
 0x1e1   : > { %v733_v56 = vsub.f32 %v2338_v24, %v692_v49  ;;  %v732_v58 = vsub.f32 %v2325_v18, %v690_v54  ;;  %v762_v7 = vsel %vm291_vm0, %v747_v50, 0.0  ;;  %v775_v6 = vsel %vm291_vm0, %v746_v62, 0.0 }
 0x1e2   : > { %v776_v26 = vadd.f32 %v775_v6, %v774_v0 }
 0x1e3   : > { %v749_v19 = vand.u32 2147483647, %v733_v56  ;;  %v748_v24 = vand.u32 2147483647, %v732_v58 }
 0x1e4   : > { %v694_v17 = vpop.permute.xlu1 %693  ;;  %v696_v59 = vpop.permute.xlu0 %695 }
 0x1e5   : > { %v735_v4 = vsub.f32 %v2355_v35, %v696_v59  ;;  %v734_v14 = vsub.f32 %v2347_v29, %v694_v17  ;;  %v761_v35 = vadd.f32 %v760_v1, %v759_v9  ;;  %v764_v34 = vsel %vm291_vm0, %v749_v19, 0.0 }
 0x1e6   : > { %v777_v40 = vsel %vm291_vm0, %v748_v24, 0.0 }
 0x1e7   : > { %v751_v18 = vand.u32 2147483647, %v735_v4  ;;  %v750_v12 = vand.u32 2147483647, %v734_v14  ;;  %v763_v15 = vadd.f32 %v762_v7, %v761_v35  ;;  %v778_v21 = vadd.f32 %v777_v40, %v776_v26 }
 0x1e8   : > { %v698_v51 = vpop.permute.xlu1 %697  ;;  %v700_v3 = vpop.permute.xlu0 %699 }
 0x1e9   : > { %v736_v28 = vsub.f32 %v2364_v41, %v698_v51  ;;  %v737_v11 = vsub.f32 %v2379_v47, %v700_v3  ;;  %v766_v23 = vsel %vm291_vm0, %v751_v18, 0.0  ;;  %v765_v42 = vadd.f32 %v764_v34, %v763_v15 }
 0x1ea   : > { %v779_v5 = vsel %vm291_vm0, %v750_v12, 0.0 }
 0x1eb   : > { %v753_v29 = vand.u32 2147483647, %v737_v11  ;;  %v752_v25 = vand.u32 2147483647, %v736_v28  ;;  %v767_v27 = vadd.f32 %v766_v23, %v765_v42  ;;  %v780_v17 = vadd.f32 %v779_v5, %v778_v21  ;;  %v2952_v5 = vld [vmem:[%s2263_s28 + $0x8] sm:$0xff] }
 0x1ec   : > { %v702_v16 = vpop.permute.xlu1 %701  ;;  %v704_v22 = vpop.permute.xlu0 %703 }
 0x1ed   : > { %v738_v41 = vsub.f32 %v2388_v53, %v702_v16  ;;  %v739_v47 = vsub.f32 %v2394_v55, %v704_v22  ;;  %v768_v54 = vsel %vm291_vm0, %v753_v29, 0.0  ;;  %v781_v20 = vsel %vm291_vm0, %v752_v25, 0.0  ;;  %v2936_v29 = vld [vmem:[%s2263_s28] sm:$0xff]  ;;  %v2944_v25 = vld [vmem:[%s2263_s28 + $0x18] sm:$0xff] }
 0x1ee   : > { %v769_v59 = vadd.f32 %v768_v54, %v767_v27  ;;  %v782_v62 = vadd.f32 %v781_v20, %v780_v17  ;;  %v2940_v16 = vld [vmem:[%s2263_s28 + $0x20] sm:$0xff]  ;;  %v2965_v17 = vld [vmem:[%s2263_s28 + $0x38] sm:$0xff] }
 0x1ef   : > { %v754_v49 = vand.u32 2147483647, %v738_v41  ;;  %v755_v8 = vand.u32 2147483647, %v739_v47  ;;  %v2948_v47 = vld [vmem:[%s2263_s28 + $0x30] sm:$0xff] }
 0x1f0   : > { %v706_v56 = vpop.permute.xlu1 %705  ;;  %v708_v13 = vpop.permute.xlu0 %707 }
 0x1f1   : > { %v770_v58 = vsel %vm291_vm0, %v755_v8, 0.0  ;;  %v740_v53 = vsub.f32 %v2402_v61, %v706_v56  ;;  %v741_v55 = vsub.f32 %v3642_v57, %v708_v13  ;;  %v783_v50 = vsel %vm291_vm0, %v754_v49, 0.0  ;;  %v2956_v49 = vld [vmem:[%s2263_s28 + $0x28] sm:$0xff]  ;;  %v2960_v13 = vld [vmem:[%s2263_s28 + $0x40] sm:$0xff] }
 0x1f2   : > { %v771_v19 = vadd.f32 %v770_v58, %v769_v59  ;;  %v784_v57 = vadd.f32 %v783_v50, %v782_v62 }
 0x1f3   : > { %v756_v4 = vand.u32 2147483647, %v740_v53  ;;  %v757_v1 = vand.u32 2147483647, %v741_v55 }
 0x1f4   : > { %v710_v14 = vpop.permute.xlu1 %709  ;;  %v793_v9 = vpop.permute.xlu0 %792 }
 0x1f5   : > { %v785_v63 = vsel %vm291_vm0, %v756_v4, 0.0  ;;  %v772_v24 = vsel %vm291_vm0, %v757_v1, 0.0  ;;  %v742_v61 = vsub.f32 %v3643_v52, %v710_v14  ;;  %v2932_v52 = vld [vmem:[%s2263_s28 + $0x10] sm:$0xff]  ;;  %v840_v0 = vsub.f32 %v2936_v29, %v793_v9 }
 0x1f6   : > { %v773_v51 = vadd.f32 %v772_v24, %v771_v19  ;;  %v786_v7 = vadd.f32 %v785_v63, %v784_v57  ;;  %v2971_v63 = vld [vmem:[%s2263_s28 + $0x48] sm:$0xff] }
 0x1f7   : > { %v758_v3 = vand.u32 2147483647, %v742_v61  ;;  %v856_v42 = vand.u32 2147483647, %v840_v0  ;;  %v2975_v61 = vld [vmem:[%s2263_s28 + $0x50] sm:$0xff] }
 0x1f8   : > { %1776 = vst.msk [vmem:[%s2447_s21 + $0x30] sm:$0xff] %vm291_vm0, %v773_v51  ;;  %v795_v18 = vpop.permute.xlu1 %794  ;;  %v797_v28 = vpop.permute.xlu0 %796 }
 0x1f9   : > { %v787_v11 = vsel %vm291_vm0, %v758_v3, 0.0  ;;  %v842_v12 = vsub.f32 %v2932_v52, %v797_v28  ;;  %v841_v54 = vsub.f32 %v2952_v5, %v795_v18  ;;  %v872_v50 = vsel %vm291_vm0, %v856_v42, 0.0 }
 0x1fa   : > { %v788_v35 = vadd.f32 %v787_v11, %v786_v7 }
 0x1fb   : > { %v858_v23 = vand.u32 2147483647, %v842_v12  ;;  %v857_v4 = vand.u32 2147483647, %v841_v54 }
 0x1fc   : > { %1777 = vst.msk [vmem:[%s2447_s21 + $0x38] sm:$0xff] %vm291_vm0, %v788_v35  ;;  %v799_v6 = vpop.permute.xlu1 %798  ;;  %v801_v34 = vpop.permute.xlu0 %800 }
 0x1fd   : > { %v844_v22 = vsub.f32 %v2940_v16, %v801_v34  ;;  %v843_v41 = vsub.f32 %v2944_v25, %v799_v6  ;;  %v873_v58 = vsel %vm291_vm0, %v858_v23, 0.0  ;;  %v887_v11 = vsel %vm291_vm0, %v857_v4, 0.0  ;;  %v2988_v23 = vld [vmem:[%s2263_s28 + $0x60] sm:$0xff] }
 0x1fe   : > { %v874_v51 = vadd.f32 %v873_v58, %v872_v50  ;;  %v2996_v50 = vld [vmem:[%s2263_s28 + $0x68] sm:$0xff] }
 0x1ff   : > { %v860_v56 = vand.u32 2147483647, %v844_v22  ;;  %v859_v53 = vand.u32 2147483647, %v843_v41 }
 0x200   : > { %v803_v15 = vpop.permute.xlu1 %802  ;;  %v805_v40 = vpop.permute.xlu0 %804 }
 0x201   : > { %v846_v26 = vsub.f32 %v2948_v47, %v805_v40  ;;  %v845_v8 = vsub.f32 %v2956_v49, %v803_v15  ;;  %v875_v14 = vsel %vm291_vm0, %v860_v56, 0.0  ;;  %v888_v3 = vsel %vm291_vm0, %v859_v53, 0.0  ;;  %v2984_v40 = vld [vmem:[%s2263_s28 + $0x58] sm:$0xff] }
 0x202   : > { %v876_v35 = vadd.f32 %v875_v14, %v874_v51 }
 0x203   : > { %v862_v55 = vand.u32 2147483647, %v846_v26  ;;  %v861_v1 = vand.u32 2147483647, %v845_v8  ;;  %v889_v26 = vadd.f32 %v888_v3, %v887_v11 }
 0x204   : > { %v807_v21 = vpop.permute.xlu1 %806  ;;  %v809_v27 = vpop.permute.xlu0 %808 }
 0x205   : > { %v848_v20 = vsub.f32 %v2960_v13, %v809_v27  ;;  %v847_v59 = vsub.f32 %v2965_v17, %v807_v21  ;;  %v877_v7 = vsel %vm291_vm0, %v862_v55, 0.0  ;;  %v890_v6 = vsel %vm291_vm0, %v861_v1, 0.0  ;;  %v3000_v1 = vld [vmem:[%s2263_s28 + $0x70] sm:$0xff] }
 0x206   : > { %v878_v42 = vadd.f32 %v877_v7, %v876_v35  ;;  %v891_v56 = vadd.f32 %v890_v6, %v889_v26  ;;  %v3007_v35 = vld [vmem:[%s2263_s28 + $0x78] sm:$0xff] }
 0x207   : > { %v864_v9 = vand.u32 2147483647, %v848_v20  ;;  %v863_v18 = vand.u32 2147483647, %v847_v59 }
 0x208   : > { %v811_v62 = vpop.permute.xlu1 %810  ;;  %v813_v19 = vpop.permute.xlu0 %812 }
 0x209   : > { %v849_v24 = vsub.f32 %v2971_v63, %v811_v62  ;;  %v850_v57 = vsub.f32 %v2975_v61, %v813_v19  ;;  %v879_v0 = vsel %vm291_vm0, %v864_v9, 0.0  ;;  %v892_v54 = vsel %vm291_vm0, %v863_v18, 0.0 }
 0x20a   : > { %v880_v20 = vadd.f32 %v879_v0, %v878_v42  ;;  %v893_v19 = vadd.f32 %v892_v54, %v891_v56 }
 0x20b   : > { %v866_v28 = vand.u32 2147483647, %v850_v57  ;;  %v865_v15 = vand.u32 2147483647, %v849_v24 }
 0x20c   : > { %v815_v34 = vpop.permute.xlu1 %814  ;;  %v817_v12 = vpop.permute.xlu0 %816 }
 0x20d   : > { %v851_v22 = vsub.f32 %v2984_v40, %v815_v34  ;;  %v852_v41 = vsub.f32 %v2988_v23, %v817_v12  ;;  %v881_v8 = vsel %vm291_vm0, %v866_v28, 0.0  ;;  %v894_v55 = vsel %vm291_vm0, %v865_v15, 0.0 }
 0x20e   : > { %v882_v14 = vadd.f32 %v881_v8, %v880_v20  ;;  %v895_v51 = vadd.f32 %v894_v55, %v893_v19  ;;  %v3043_v55 = vld [vmem:[%s2271_s3 + $0x198] sm:$0xff] }
 0x20f   : > { %v867_v21 = vand.u32 2147483647, %v851_v22  ;;  %v868_v27 = vand.u32 2147483647, %v852_v41  ;;  %v3063_v19 = vld [vmem:[%s2271_s3 + $0x1b8] sm:$0xff] }
 0x210   : > { %v819_v58 = vpop.permute.xlu1 %818  ;;  %v821_v53 = vpop.permute.xlu0 %820 }
 0x211   : > { %v883_v59 = vsel %vm291_vm0, %v868_v27, 0.0  ;;  %v853_v4 = vsub.f32 %v2996_v50, %v819_v58  ;;  %v854_v62 = vsub.f32 %v3000_v1, %v821_v53  ;;  %v896_v9 = vsel %vm291_vm0, %v867_v21, 0.0  ;;  %v3023_v27 = vld [vmem:[%s2271_s3 + $0x180] sm:$0xff]  ;;  %v3033_v58 = vld [vmem:[%s2271_s3 + $0x188] sm:$0xff]  ;;  %v3036_v53 = vld [vmem:[%s2271_s3 + $0x190] sm:$0xff] }
 0x212   : > { %v884_v3 = vadd.f32 %v883_v59, %v882_v14  ;;  %v897_v12 = vadd.f32 %v896_v9, %v895_v51  ;;  %v3046_v59 = vld [vmem:[%s2271_s3 + $0x1a0] sm:$0xff]  ;;  %v3073_v9 = vld [vmem:[%s2271_s3 + $0x1c8] sm:$0xff]  ;;  %v3083_v51 = vld [vmem:[%s2271_s3 + $0x1d8] sm:$0xff] }
 0x213   : > { %v869_v24 = vand.u32 2147483647, %v853_v4  ;;  %v870_v57 = vand.u32 2147483647, %v854_v62  ;;  %v3053_v4 = vld [vmem:[%s2271_s3 + $0x1a8] sm:$0xff]  ;;  %v3056_v62 = vld [vmem:[%s2271_s3 + $0x1b0] sm:$0xff] }
 0x214   : > { %v823_v7 = vpop.permute.xlu1 %822  ;;  %v953_v18 = vpop.permute.xlu0 %952  ;;  %v3066_v14 = vld [vmem:[%s2271_s3 + $0x1c0] sm:$0xff] }
 0x215   : > { %v898_v28 = vsel %vm291_vm0, %v869_v24, 0.0  ;;  %v885_v11 = vsel %vm291_vm0, %v870_v57, 0.0  ;;  %v855_v6 = vsub.f32 %v3007_v35, %v823_v7  ;;  %v954_v34 = vsel %vm324_vm1, %v953_v18, %v2799_v45  ;;  %v3076_v24 = vld [vmem:[%s2271_s3 + $0x1d0] sm:$0xff] }
 0x216   : > { %v886_v0 = vadd.f32 %v885_v11, %v884_v3  ;;  %990 = vrot.lane.b32.xlu0 %v954_v34, %s2074_s15  ;;  %v899_v22 = vadd.f32 %v898_v28, %v897_v12  ;;  %v3086_v3 = vld [vmem:[%s2271_s3 + $0x1e0] sm:$0xff]  ;;  %v3093_v28 = vld [vmem:[%s2271_s3 + $0x1e8] sm:$0xff]  ;;  %v3096_v11 = vld [vmem:[%s2271_s3 + $0x1f0] sm:$0xff] }
 0x217   : > { %v871_v15 = vand.u32 2147483647, %v855_v6  ;;  %v3105_v12 = vld [vmem:[%s2271_s3 + $0x1f8] sm:$0xff] }
 0x218   : > { %1778 = vst.msk [vmem:[%s2447_s21 + $0x70] sm:$0xff] %vm291_vm0, %v886_v0  ;;  %v956_v41 = vpop.permute.xlu1 %955  ;;  %v959_v26 = vpop.permute.xlu0 %958 }
 0x219   : > { %v900_v42 = vsel %vm291_vm0, %v871_v15, 0.0  ;;  %v957_v54 = vsel %vm324_vm1, %v956_v41, %v2805_v48  ;;  %v960_v8 = vsel %vm324_vm1, %v959_v26, %v2808_v46 }
 0x21a   : > { %v901_v21 = vadd.f32 %v900_v42, %v899_v22  ;;  %992 = vrot.lane.b32.xlu1 %v957_v54, %s2074_s15  ;;  %994 = vrot.lane.b32.xlu0 %v960_v8, %s2074_s15 }
 0x21c   : > { %1779 = vst.msk [vmem:[%s2447_s21 + $0x78] sm:$0xff] %vm291_vm0, %v901_v21  ;;  %v962_v56 = vpop.permute.xlu1 %961  ;;  %v965_v57 = vpop.permute.xlu0 %964 }
 0x21d   : > { %v963_v20 = vsel %vm324_vm1, %v962_v56, %v2815_v2  ;;  %v966_v34 = vsel %vm324_vm1, %v965_v57, %v2818_v60 }
 0x21e   : > { %996 = vrot.lane.b32.xlu1 %v963_v20, %s2074_s15  ;;  %1277 = vrot.lane.b32.xlu0 %v3023_v27, %s2074_s15 }
 0x220   : > { %v968_v7 = vpop.permute.xlu1 %967  ;;  %v971_v18 = vpop.permute.xlu0 %970 }
 0x221   : > { %v969_v15 = vsel %vm324_vm1, %v968_v7, %v2825_v10  ;;  %v3114_v41 = vsel %vm324_vm1, %v971_v18, %v2637_v30 }
 0x222   : > { %1280 = vrot.lane.b32.xlu1 %v3033_v58, %s2074_s15  ;;  %1283 = vrot.lane.b32.xlu0 %v3036_v53, %s2074_s15 }
 0x224   : > { %v973_v6 = vpop.permute.xlu1 %972  ;;  %v975_v0 = vpop.permute.xlu0 %974 }
 0x225   : > { %v3121_v42 = vsel %vm324_vm1, %v973_v6, %v2643_v31  ;;  %v3125_v54 = vsel %vm324_vm1, %v975_v0, %v2646_v32 }
 0x226   : > { %1286 = vrot.lane.b32.xlu1 %v3043_v55, %s2074_s15  ;;  %1289 = vrot.lane.b32.xlu0 %v3046_v59, %s2074_s15 }
 0x228   : > { %v977_v22 = vpop.permute.xlu1 %976  ;;  %v979_v26 = vpop.permute.xlu0 %978 }
 0x229   : > { %v3133_v21 = vsel %vm324_vm1, %v977_v22, %v2653_v33  ;;  %v3137_v31 = vsel %vm324_vm1, %v979_v26, %v2656_v36 }
 0x22a   : > { %1292 = vrot.lane.b32.xlu1 %v3053_v4, %s2074_s15  ;;  %1295 = vrot.lane.b32.xlu0 %v3056_v62, %s2074_s15 }
 0x22c   : > { %v981_v8 = vpop.permute.xlu1 %980  ;;  %v983_v30 = vpop.permute.xlu0 %982 }
 0x22d   : > { %v3145_v56 = vsel %vm324_vm1, %v981_v8, %v2663_v37  ;;  %v3149_v20 = vsel %vm324_vm1, %v983_v30, %v2666_v38 }
 0x22e   : > { %1298 = vrot.lane.b32.xlu1 %v3063_v19, %s2074_s15  ;;  %1301 = vrot.lane.b32.xlu0 %v3066_v14, %s2074_s15 }
 0x230   : > { %v985_v32 = vpop.permute.xlu1 %984  ;;  %v987_v33 = vpop.permute.xlu0 %986 }
 0x231   : > { %v3157_v36 = vsel %vm324_vm1, %v985_v32, %v2673_v39  ;;  %v3161_v57 = vsel %vm324_vm1, %v987_v33, %v2676_v43 }
 0x232   : > { %1304 = vrot.lane.b32.xlu1 %v3073_v9, %s2074_s15  ;;  %1307 = vrot.lane.b32.xlu0 %v3076_v24, %s2074_s15 }
 0x234   : > { %v989_v37 = vpop.permute.xlu1 %988 }
 0x235   : > { %v3169_v38 = vsel %vm324_vm1, %v989_v37, %v2683_v44 }
 0x236   : > { %1310 = vrot.lane.b32.xlu1 %v3083_v51, %s2074_s15  ;;  %1313 = vrot.lane.b32.xlu0 %v3086_v3, %s2074_s15 }
 0x23a   : > { %1316 = vrot.lane.b32.xlu1 %v3093_v28, %s2074_s15  ;;  %1319 = vrot.lane.b32.xlu0 %v3096_v11, %s2074_s15 }
 0x23e   : > { %1322 = vrot.lane.b32.xlu1 %v3105_v12, %s2074_s15  ;;  %998 = vrot.lane.b32.xlu0 %v966_v34, %s2074_s15 }
 0x242   : > { %1000 = vrot.lane.b32.xlu1 %v969_v15, %s2074_s15  ;;  %1034 = vrot.lane.b32.xlu0 %v3114_v41, %s2075_s19 }
 0x246   : > { %1036 = vrot.lane.b32.xlu1 %v3121_v42, %s2075_s19  ;;  %1038 = vrot.lane.b32.xlu0 %v3125_v54, %s2075_s19 }
 0x24a   : > { %1040 = vrot.lane.b32.xlu1 %v3133_v21, %s2075_s19  ;;  %1042 = vrot.lane.b32.xlu0 %v3137_v31, %s2075_s19 }
 0x24e   : > { %1044 = vrot.lane.b32.xlu1 %v3145_v56, %s2075_s19  ;;  %1046 = vrot.lane.b32.xlu0 %v3149_v20, %s2075_s19 }
 0x252   : > { %1048 = vrot.lane.b32.xlu1 %v3157_v36, %s2075_s19  ;;  %1050 = vrot.lane.b32.xlu0 %v3161_v57, %s2075_s19 }
 0x256   : > { %1052 = vrot.lane.b32.xlu1 %v3169_v38, %s2075_s19 }
 0x288   : > { %v991_v39 = vpop.permute.xlu0 %990 }
 0x289   : > { %v3175_v7 = vsel %vm324_vm1, %v991_v39, %v2799_v45 }
 0x28a   : > { %1054 = vrot.lane.b32.xlu0 %v3175_v7, %s2075_s19 }
 0x28c   : > { %v993_v43 = vpop.permute.xlu1 %992  ;;  %v995_v18 = vpop.permute.xlu0 %994 }
 0x28d   : > { %v3181_v6 = vsel %vm324_vm1, %v993_v43, %v2805_v48 }
 0x28e   : > { %1056 = vrot.lane.b32.xlu1 %v3181_v6, %s2075_s19 }
 0x290   : > { %v997_v44 = vpop.permute.xlu1 %996  ;;  %v1278_v34 = vpop.permute.xlu0 %1277 }
 0x291   : > { %v1279_v0 = vsel %vm324_vm1, %v1278_v34, %v3023_v27 }
 0x292   : > { %1325 = vrot.lane.b32.xlu0 %v1279_v0, %s2074_s15 }
 0x294   : > { %v1281_v45 = vpop.permute.xlu1 %1280  ;;  %v1284_v15 = vpop.permute.xlu0 %1283 }
 0x295   : > { %v1282_v22 = vsel %vm324_vm1, %v1281_v45, %v3033_v58  ;;  %v1285_v26 = vsel %vm324_vm1, %v1284_v15, %v3036_v53 }
 0x296   : > { %1327 = vrot.lane.b32.xlu1 %v1282_v22, %s2074_s15  ;;  %1329 = vrot.lane.b32.xlu0 %v1285_v26, %s2074_s15 }
 0x298   : > { %v1287_v48 = vpop.permute.xlu1 %1286  ;;  %v1290_v8 = vpop.permute.xlu0 %1289 }
 0x299   : > { %v1288_v30 = vsel %vm324_vm1, %v1287_v48, %v3043_v55  ;;  %v1291_v32 = vsel %vm324_vm1, %v1290_v8, %v3046_v59 }
 0x29a   : > { %1331 = vrot.lane.b32.xlu1 %v1288_v30, %s2074_s15  ;;  %1333 = vrot.lane.b32.xlu0 %v1291_v32, %s2074_s15 }
 0x29c   : > { %v1293_v33 = vpop.permute.xlu1 %1292  ;;  %v1296_v37 = vpop.permute.xlu0 %1295 }
 0x29d   : > { %v1294_v39 = vsel %vm324_vm1, %v1293_v33, %v3053_v4  ;;  %v1297_v43 = vsel %vm324_vm1, %v1296_v37, %v3056_v62 }
 0x29e   : > { %1335 = vrot.lane.b32.xlu1 %v1294_v39, %s2074_s15  ;;  %1337 = vrot.lane.b32.xlu0 %v1297_v43, %s2074_s15 }
 0x2a0   : > { %v1299_v34 = vpop.permute.xlu1 %1298  ;;  %v1302_v0 = vpop.permute.xlu0 %1301 }
 0x2a1   : > { %v1300_v45 = vsel %vm324_vm1, %v1299_v34, %v3063_v19  ;;  %v1303_v15 = vsel %vm324_vm1, %v1302_v0, %v3066_v14 }
 0x2a2   : > { %1339 = vrot.lane.b32.xlu1 %v1300_v45, %s2074_s15  ;;  %1341 = vrot.lane.b32.xlu0 %v1303_v15, %s2074_s15  ;;  %v3232_v15 = vsel %vm324_vm1, %v995_v18, %v2808_v46 }
 0x2a4   : > { %v1305_v22 = vpop.permute.xlu1 %1304  ;;  %v1308_v26 = vpop.permute.xlu0 %1307 }
 0x2a5   : > { %v1306_v48 = vsel %vm324_vm1, %v1305_v22, %v3073_v9  ;;  %v1309_v8 = vsel %vm324_vm1, %v1308_v26, %v3076_v24 }
 0x2a6   : > { %1343 = vrot.lane.b32.xlu1 %v1306_v48, %s2074_s15  ;;  %1345 = vrot.lane.b32.xlu0 %v1309_v8, %s2074_s15  ;;  %v3245_v8 = vsel %vm324_vm1, %v997_v44, %v2815_v2 }
 0x2a8   : > { %v1311_v30 = vpop.permute.xlu1 %1310  ;;  %v1314_v32 = vpop.permute.xlu0 %1313 }
 0x2a9   : > { %v1312_v33 = vsel %vm324_vm1, %v1311_v30, %v3083_v51  ;;  %v1315_v37 = vsel %vm324_vm1, %v1314_v32, %v3086_v3 }
 0x2aa   : > { %1347 = vrot.lane.b32.xlu1 %v1312_v33, %s2074_s15  ;;  %1349 = vrot.lane.b32.xlu0 %v1315_v37, %s2074_s15 }
 0x2ac   : > { %v1317_v39 = vpop.permute.xlu1 %1316  ;;  %v1320_v43 = vpop.permute.xlu0 %1319 }
 0x2ad   : > { %v1318_v34 = vsel %vm324_vm1, %v1317_v39, %v3093_v28  ;;  %v1321_v0 = vsel %vm324_vm1, %v1320_v43, %v3096_v11 }
 0x2ae   : > { %1351 = vrot.lane.b32.xlu1 %v1318_v34, %s2074_s15  ;;  %1353 = vrot.lane.b32.xlu0 %v1321_v0, %s2074_s15 }
 0x2b0   : > { %v1323_v45 = vpop.permute.xlu1 %1322  ;;  %v999_v26 = vpop.permute.xlu0 %998 }
 0x2b1   : > { %v1324_v22 = vsel %vm324_vm1, %v1323_v45, %v3105_v12  ;;  %v3241_v48 = vsel %vm324_vm1, %v999_v26, %v2818_v60 }
 0x2b2   : > { %1355 = vrot.lane.b32.xlu1 %v1324_v22, %s2074_s15  ;;  %1058 = vrot.lane.b32.xlu0 %v3232_v15, %s2075_s19 }
 0x2b4   : > { %v1001_v30 = vpop.permute.xlu1 %1000  ;;  %v1035_v2 = vpop.permute.xlu0 %1034 }
 0x2b5   : > { %v3253_v46 = vsel %vm324_vm1, %v1001_v30, %v2825_v10  ;;  %v1082_v30 = vsub.f32 %v2936_v29, %v1035_v2 }
 0x2b6   : > { %1060 = vrot.lane.b32.xlu1 %v3245_v8, %s2075_s19  ;;  %1062 = vrot.lane.b32.xlu0 %v3241_v48, %s2075_s19 }
 0x2b8   : > { %v1037_v60 = vpop.permute.xlu1 %1036  ;;  %v1039_v10 = vpop.permute.xlu0 %1038 }
 0x2b9   : > { %v1083_v2 = vsub.f32 %v2952_v5, %v1037_v60 }
 0x2ba   : > { %1064 = vrot.lane.b32.xlu1 %v3253_v46, %s2075_s19  ;;  %1147 = vrot.lane.b32.xlu0 %v3114_v41, %s2076_s26 }
 0x2bc   : > { %v1041_v41 = vpop.permute.xlu1 %1040 }
 0x2be   : > { %1149 = vrot.lane.b32.xlu1 %v3121_v42, %s2076_s26  ;;  %1151 = vrot.lane.b32.xlu0 %v3125_v54, %s2076_s26  ;;  %v1043_v42 = vpop.permute.xlu0 %1042 }
 0x2c0   : > { %v1045_v54 = vpop.permute.xlu1 %1044 }
 0x2c2   : > { %1153 = vrot.lane.b32.xlu1 %v3133_v21, %s2076_s26  ;;  %1155 = vrot.lane.b32.xlu0 %v3137_v31, %s2076_s26  ;;  %v1047_v21 = vpop.permute.xlu0 %1046 }
 0x2c4   : > { %v3275_v31 = vpop.permute.xlu1 %1048 }
 0x2c6   : > { %1157 = vrot.lane.b32.xlu1 %v3145_v56, %s2076_s26  ;;  %1159 = vrot.lane.b32.xlu0 %v3149_v20, %s2076_s26  ;;  %v1051_v18 = vpop.permute.xlu0 %1050 }
 0x2c8   : > { %v3277_v56 = vpop.permute.xlu1 %1052 }
 0x2ca   : > { %1161 = vrot.lane.b32.xlu1 %v3157_v36, %s2076_s26  ;;  %1163 = vrot.lane.b32.xlu0 %v3161_v57, %s2076_s26 }
 0x2fc   : > { %v1055_v44 = vpop.permute.xlu0 %1054 }
 0x300   : > { %v3279_v20 = vpop.permute.xlu1 %1056 }
 0x304   : > { %v1326_v32 = vpop.permute.xlu0 %1325 }
 0x305   : > { %v1357_v36 = vsel %vm324_vm1, %v1326_v32, %v3023_v27 }
 0x306   : > { %1389 = vrot.lane.b32.xlu1 %v1357_v36, %s2075_s19 }
 0x308   : > { %v1328_v57 = vpop.permute.xlu1 %1327  ;;  %v1330_v33 = vpop.permute.xlu0 %1329 }
 0x309   : > { %v1358_v37 = vsel %vm324_vm1, %v1328_v57, %v3033_v58  ;;  %v1359_v39 = vsel %vm324_vm1, %v1330_v33, %v3036_v53  ;;  %v1086_v57 = vsub.f32 %v2940_v16, %v1043_v42  ;;  %v1085_v33 = vsub.f32 %v2944_v25, %v1041_v41 }
 0x30a   : > { %1391 = vrot.lane.b32.xlu0 %v1358_v37, %s2075_s19  ;;  %1393 = vrot.lane.b32.xlu1 %v1359_v39, %s2075_s19  ;;  %v1089_v41 = vsub.f32 %v2965_v17, %v3275_v31 }
 0x30b   : > { %v1102_v42 = vand.u32 2147483647, %v1086_v57  ;;  %v1101_v60 = vand.u32 2147483647, %v1085_v33 }
 0x30c   : > { %v1332_v43 = vpop.permute.xlu1 %1331  ;;  %v1334_v34 = vpop.permute.xlu0 %1333 }
 0x30d   : > { %v1360_v0 = vsel %vm324_vm1, %v1332_v43, %v3043_v55  ;;  %v1361_v58 = vsel %vm324_vm1, %v1334_v34, %v3046_v59  ;;  %v1084_v55 = vsub.f32 %v2932_v52, %v1039_v10  ;;  %v1087_v34 = vsub.f32 %v2956_v49, %v1045_v54 }
 0x30e   : > { %1395 = vrot.lane.b32.xlu0 %v1360_v0, %s2075_s19  ;;  %1502 = vrot.lane.b32.xlu1 %v1357_v36, %s2076_s26  ;;  %v1117_v31 = vsel %vm291_vm0, %v1102_v42, 0.0 }
 0x30f   : > { %v1100_v59 = vand.u32 2147483647, %v1084_v55 }
 0x310   : > { %v1336_v27 = vpop.permute.xlu1 %1335  ;;  %v1338_v45 = vpop.permute.xlu0 %1337 }
 0x311   : > { %v1362_v26 = vsel %vm324_vm1, %v1336_v27, %v3053_v4  ;;  %v1363_v10 = vsel %vm324_vm1, %v1338_v45, %v3056_v62  ;;  %v1098_v4 = vand.u32 2147483647, %v1082_v30  ;;  %v1115_v62 = vsel %vm291_vm0, %v1100_v59, 0.0 }
 0x312   : > { %1504 = vrot.lane.b32.xlu0 %v1358_v37, %s2076_s26  ;;  %1506 = vrot.lane.b32.xlu1 %v1359_v39, %s2076_s26  ;;  %v1088_v37 = vsub.f32 %v2948_v47, %v1047_v21  ;;  %v1092_v21 = vsub.f32 %v2975_v61, %v1055_v44  ;;  %v1103_v44 = vand.u32 2147483647, %v1087_v34  ;;  %v1091_v30 = vsub.f32 %v2971_v63, %v3277_v56 }
 0x313   : > { %v1114_v54 = vsel %vm291_vm0, %v1098_v4, 0.0  ;;  %v1105_v59 = vand.u32 2147483647, %v1089_v41 }
 0x314   : > { %v1340_v53 = vpop.permute.xlu1 %1339  ;;  %v1342_v22 = vpop.permute.xlu0 %1341  ;;  %v1104_v27 = vand.u32 2147483647, %v1088_v37  ;;  %v1116_v57 = vadd.f32 %v1115_v62, %v1114_v54  ;;  %v1108_v33 = vand.u32 2147483647, %v1092_v21  ;;  %v1093_v37 = vsub.f32 %v2984_v40, %v3279_v20 }
 0x315   : > { %v1364_v45 = vsel %vm324_vm1, %v1340_v53, %v3063_v19  ;;  %v1130_v19 = vsel %vm291_vm0, %v1101_v60, 0.0  ;;  %v1132_v34 = vsel %vm291_vm0, %v1103_v44, 0.0  ;;  %v1107_v41 = vand.u32 2147483647, %v1091_v30 }
 0x316   : > { %1508 = vrot.lane.b32.xlu0 %v1360_v0, %s2076_s26  ;;  %1397 = vrot.lane.b32.xlu1 %v1361_v58, %s2075_s19  ;;  %v1090_v0 = vsub.f32 %v2960_v13, %v1051_v18  ;;  %v1119_v53 = vsel %vm291_vm0, %v1104_v27, 0.0  ;;  %v1134_v60 = vsel %vm291_vm0, %v1105_v59, 0.0  ;;  %v1123_v27 = vsel %vm291_vm0, %v1108_v33, 0.0 }
 0x317   : > { %v1109_v20 = vand.u32 2147483647, %v1093_v37  ;;  %v1365_v54 = vsel %vm324_vm1, %v1342_v22, %v3066_v14  ;;  %v1136_v59 = vsel %vm291_vm0, %v1107_v41, 0.0 }
 0x318   : > { %v1344_v32 = vpop.permute.xlu1 %1343  ;;  %v3304_v36 = vpop.permute.xlu0 %1345 }
 0x319   : > { %v1138_v14 = vsel %vm291_vm0, %v1109_v20, 0.0 }
 0x31a   : > { %1399 = vrot.lane.b32.xlu0 %v1362_v26, %s2075_s19  ;;  %1510 = vrot.lane.b32.xlu1 %v1361_v58, %s2076_s26  ;;  %v1099_v58 = vand.u32 2147483647, %v1083_v2  ;;  %v1118_v2 = vadd.f32 %v1117_v31, %v1116_v57 }
 0x31c   : > { %v3314_v39 = vpop.permute.xlu1 %1347  ;;  %v3316_v43 = vpop.permute.xlu0 %1349  ;;  %v1129_v4 = vsel %vm291_vm0, %v1099_v58, 0.0  ;;  %v1120_v62 = vadd.f32 %v1119_v53, %v1118_v2  ;;  %v1366_v58 = vsel %vm324_vm1, %v1344_v32, %v3073_v9 }
 0x31d   : > { %v1131_v21 = vadd.f32 %v1130_v19, %v1129_v4 }
 0x31e   : > { %1512 = vrot.lane.b32.xlu0 %v1362_v26, %s2076_s26  ;;  %1401 = vrot.lane.b32.xlu1 %v1363_v10, %s2075_s19  ;;  %v1106_v26 = vand.u32 2147483647, %v1090_v0 }
 0x31f   : > { %v1133_v44 = vadd.f32 %v1132_v34, %v1131_v21 }
 0x320   : > { %v3329_v18 = vpop.permute.xlu1 %1351  ;;  %v3331_v55 = vpop.permute.xlu0 %1353  ;;  %v1121_v0 = vsel %vm291_vm0, %v1106_v26, 0.0 }
 0x321   : > { %v1122_v26 = vadd.f32 %v1121_v0, %v1120_v62  ;;  %v1135_v19 = vadd.f32 %v1134_v60, %v1133_v44 }
 0x322   : > { %1403 = vrot.lane.b32.xlu0 %v1364_v45, %s2075_s19  ;;  %1514 = vrot.lane.b32.xlu1 %v1363_v10, %s2076_s26 }
 0x323   : > { %v1124_v53 = vadd.f32 %v1123_v27, %v1122_v26  ;;  %v1137_v32 = vadd.f32 %v1136_v59, %v1135_v19 }
 0x324   : > { %v3343_v42 = vpop.permute.xlu1 %1355  ;;  %v1059_v56 = vpop.permute.xlu0 %1058 }
 0x325   : > { %v1094_v10 = vsub.f32 %v2988_v23, %v1059_v56 }
 0x326   : > { %1516 = vrot.lane.b32.xlu0 %v1364_v45, %s2076_s26  ;;  %1165 = vrot.lane.b32.xlu1 %v3169_v38, %s2076_s26 }
 0x327   : > { %v1110_v31 = vand.u32 2147483647, %v1094_v10  ;;  %v1139_v10 = vadd.f32 %v1138_v14, %v1137_v32 }
 0x328   : > { %v1061_v30 = vpop.permute.xlu1 %1060  ;;  %v1063_v57 = vpop.permute.xlu0 %1062 }
 0x329   : > { %v1125_v33 = vsel %vm291_vm0, %v1110_v31, 0.0  ;;  %v1095_v45 = vsub.f32 %v2996_v50, %v1061_v30  ;;  %v1096_v38 = vsub.f32 %v3000_v1, %v1063_v57 }
 0x32a   : > { %1407 = vrot.lane.b32.xlu1 %v1366_v58, %s2075_s19  ;;  %1405 = vrot.lane.b32.xlu0 %v1365_v54, %s2075_s19  ;;  %v1126_v37 = vadd.f32 %v1125_v33, %v1124_v53 }
 0x32b   : > { %v1111_v9 = vand.u32 2147483647, %v1095_v45  ;;  %v1112_v22 = vand.u32 2147483647, %v1096_v38 }
 0x32c   : > { %v1065_v4 = vpop.permute.xlu1 %1064  ;;  %v1148_v2 = vpop.permute.xlu0 %1147 }
 0x32d   : > { %v1140_v56 = vsel %vm291_vm0, %v1111_v9, 0.0  ;;  %v1127_v34 = vsel %vm291_vm0, %v1112_v22, 0.0  ;;  %v1097_v0 = vsub.f32 %v3007_v35, %v1065_v4  ;;  %v1195_v41 = vsub.f32 %v2936_v29, %v1148_v2 }
 0x32e   : > { %v1128_v21 = vadd.f32 %v1127_v34, %v1126_v37  ;;  %1520 = vrot.lane.b32.xlu1 %v1366_v58, %s2076_s26  ;;  %1518 = vrot.lane.b32.xlu0 %v1365_v54, %s2076_s26  ;;  %v1141_v60 = vadd.f32 %v1140_v56, %v1139_v10  ;;  %v1367_v54 = vsel %vm324_vm1, %v3304_v36, %v3076_v24 }
 0x32f   : > { %v1113_v62 = vand.u32 2147483647, %v1097_v0  ;;  %v1211_v44 = vand.u32 2147483647, %v1195_v41  ;;  %v1368_v58 = vsel %vm324_vm1, %v3314_v39, %v3083_v51 }
 0x330   : > { %1796 = vst.msk [vmem:[%s2447_s21 + $0x20] sm:$0xff] %vm291_vm0, %v1128_v21  ;;  %v1150_v27 = vpop.permute.xlu1 %1149  ;;  %v1152_v20 = vpop.permute.xlu0 %1151 }
 0x331   : > { %v1142_v31 = vsel %vm291_vm0, %v1113_v62, 0.0  ;;  %v1196_v26 = vsub.f32 %v2952_v5, %v1150_v27  ;;  %v1197_v30 = vsub.f32 %v2932_v52, %v1152_v20  ;;  %v1227_v19 = vsel %vm291_vm0, %v1211_v44, 0.0 }
 0x332   : > { %v1143_v57 = vadd.f32 %v1142_v31, %v1141_v60  ;;  %1169 = vrot.lane.b32.xlu1 %v3181_v6, %s2076_s26  ;;  %1167 = vrot.lane.b32.xlu0 %v3175_v7, %s2076_s26  ;;  %v1369_v20 = vsel %vm324_vm1, %v3316_v43, %v3086_v3  ;;  %v1370_v31 = vsel %vm324_vm1, %v3329_v18, %v3093_v28 }
 0x333   : > { %v1213_v59 = vand.u32 2147483647, %v1197_v30  ;;  %v1212_v33 = vand.u32 2147483647, %v1196_v26  ;;  %v1371_v3 = vsel %vm324_vm1, %v3331_v55, %v3096_v11  ;;  %v1372_v28 = vsel %vm324_vm1, %v3343_v42, %v3105_v12 }
 0x334   : > { %1797 = vst.msk [vmem:[%s2447_s21 + $0x28] sm:$0xff] %vm291_vm0, %v1143_v57  ;;  %v1154_v45 = vpop.permute.xlu1 %1153  ;;  %v1156_v38 = vpop.permute.xlu0 %1155 }
 0x335   : > { %v1228_v6 = vsel %vm291_vm0, %v1213_v59, 0.0  ;;  %v1198_v7 = vsub.f32 %v2944_v25, %v1154_v45  ;;  %v1199_v53 = vsub.f32 %v2940_v16, %v1156_v38  ;;  %v1242_v36 = vsel %vm291_vm0, %v1212_v33, 0.0 }
 0x336   : > { %v1229_v14 = vadd.f32 %v1228_v6, %v1227_v19  ;;  %1411 = vrot.lane.b32.xlu1 %v1368_v58, %s2075_s19  ;;  %1409 = vrot.lane.b32.xlu0 %v1367_v54, %s2075_s19 }
 0x337   : > { %v1214_v24 = vand.u32 2147483647, %v1198_v7  ;;  %v1215_v51 = vand.u32 2147483647, %v1199_v53 }
 0x338   : > { %v1158_v39 = vpop.permute.xlu1 %1157  ;;  %v1160_v9 = vpop.permute.xlu0 %1159 }
 0x339   : > { %v1243_v22 = vsel %vm291_vm0, %v1214_v24, 0.0  ;;  %v1230_v32 = vsel %vm291_vm0, %v1215_v51, 0.0  ;;  %v1200_v37 = vsub.f32 %v2956_v49, %v1158_v39  ;;  %v1201_v4 = vsub.f32 %v2948_v47, %v1160_v9 }
 0x33a   : > { %v1244_v2 = vadd.f32 %v1243_v22, %v1242_v36  ;;  %v1231_v56 = vadd.f32 %v1230_v32, %v1229_v14  ;;  %1524 = vrot.lane.b32.xlu1 %v1368_v58, %s2076_s26  ;;  %1522 = vrot.lane.b32.xlu0 %v1367_v54, %s2076_s26 }
 0x33b   : > { %v1216_v34 = vand.u32 2147483647, %v1200_v37  ;;  %v1217_v0 = vand.u32 2147483647, %v1201_v4 }
 0x33c   : > { %v1162_v41 = vpop.permute.xlu1 %1161 }
 0x33d   : > { %v1245_v10 = vsel %vm291_vm0, %v1216_v34, 0.0  ;;  %v1232_v21 = vsel %vm291_vm0, %v1217_v0, 0.0  ;;  %v1202_v62 = vsub.f32 %v2965_v17, %v1162_v41 }
 0x33e   : > { %v1246_v60 = vadd.f32 %v1245_v10, %v1244_v2  ;;  %v3403_v27 = vadd.f32 %v1232_v21, %v1231_v56  ;;  %1173 = vrot.lane.b32.xlu1 %v3245_v8, %s2076_s26  ;;  %1171 = vrot.lane.b32.xlu0 %v3232_v15, %s2076_s26  ;;  %v1164_v15 = vpop.permute.xlu0 %1163 }
 0x33f   : > { %v1218_v44 = vand.u32 2147483647, %v1202_v62  ;;  %v1203_v53 = vsub.f32 %v2960_v13, %v1164_v15 }
 0x341   : > { %v1247_v26 = vsel %vm291_vm0, %v1218_v44, 0.0  ;;  %v1219_v22 = vand.u32 2147483647, %v1203_v53 }
 0x342   : > { %v3416_v30 = vadd.f32 %v1247_v26, %v1246_v60  ;;  %1415 = vrot.lane.b32.xlu1 %v1370_v31, %s2075_s19  ;;  %1413 = vrot.lane.b32.xlu0 %v1369_v20, %s2075_s19 }
 0x346   : > { %1528 = vrot.lane.b32.xlu1 %v1370_v31, %s2076_s26  ;;  %1526 = vrot.lane.b32.xlu0 %v1369_v20, %s2076_s26 }
 0x34a   : > { %1177 = vrot.lane.b32.xlu1 %v3253_v46, %s2076_s26  ;;  %1175 = vrot.lane.b32.xlu0 %v3241_v48, %s2076_s26 }
 0x34e   : > { %1419 = vrot.lane.b32.xlu1 %v1372_v28, %s2075_s19  ;;  %1417 = vrot.lane.b32.xlu0 %v1371_v3, %s2075_s19 }
 0x352   : > { %1532 = vrot.lane.b32.xlu1 %v1372_v28, %s2076_s26  ;;  %1530 = vrot.lane.b32.xlu0 %v1371_v3, %s2076_s26 }
 0x378   : > { %v1390_v8 = vpop.permute.xlu1 %1389 }
 0x379   : > { %v1437_v14 = vsub.f32 %v2936_v29, %v1390_v8 }
 0x37b   : > { %v1453_v32 = vand.u32 2147483647, %v1437_v14 }
 0x37c   : > { %v1394_v46 = vpop.permute.xlu1 %1393  ;;  %v1392_v48 = vpop.permute.xlu0 %1391 }
 0x37d   : > { %v1439_v24 = vsub.f32 %v2932_v52, %v1394_v46  ;;  %v1438_v51 = vsub.f32 %v2952_v5, %v1392_v48 }
 0x37f   : > { %v1455_v4 = vand.u32 2147483647, %v1439_v24  ;;  %v1454_v56 = vand.u32 2147483647, %v1438_v51 }
 0x380   : > { %v1503_v43 = vpop.permute.xlu1 %1502  ;;  %v1396_v18 = vpop.permute.xlu0 %1395 }
 0x381   : > { %v1440_v36 = vsub.f32 %v2944_v25, %v1396_v18  ;;  %v1550_v2 = vsub.f32 %v2936_v29, %v1503_v43  ;;  %v1469_v29 = vsel %vm291_vm0, %v1453_v32, 0.0  ;;  %v1470_v44 = vsel %vm291_vm0, %v1455_v4, 0.0 }
 0x382   : > { %v1484_v28 = vsel %vm291_vm0, %v1454_v56, 0.0 }
 0x383   : > { %v1456_v34 = vand.u32 2147483647, %v1440_v36  ;;  %v1566_v26 = vand.u32 2147483647, %v1550_v2 }
 0x384   : > { %v1507_v57 = vpop.permute.xlu1 %1506  ;;  %v1505_v11 = vpop.permute.xlu0 %1504 }
 0x385   : > { %v1552_v37 = vsub.f32 %v2932_v52, %v1507_v57  ;;  %v1551_v62 = vsub.f32 %v2952_v5, %v1505_v11  ;;  %v1234_v52 = vsel %vm291_vm0, %v1219_v22, 0.0  ;;  %v1485_v5 = vsel %vm291_vm0, %v1456_v34, 0.0 }
 0x386   : > { %v3476_v48 = vadd.f32 %v1234_v52, %v3403_v27  ;;  %v1471_v11 = vadd.f32 %v1470_v44, %v1469_v29 }
 0x387   : > { %v1568_v31 = vand.u32 2147483647, %v1552_v37  ;;  %v1567_v43 = vand.u32 2147483647, %v1551_v62 }
 0x388   : > { %v1398_v55 = vpop.permute.xlu1 %1397  ;;  %v1509_v54 = vpop.permute.xlu0 %1508 }
 0x389   : > { %v1441_v0 = vsub.f32 %v2940_v16, %v1398_v55  ;;  %v1553_v41 = vsub.f32 %v2944_v25, %v1509_v54  ;;  %v1583_v55 = vsel %vm291_vm0, %v1568_v31, 0.0 }
 0x38b   : > { %v1457_v15 = vand.u32 2147483647, %v1441_v0 }
 0x38c   : > { %v1511_v58 = vpop.permute.xlu1 %1510  ;;  %v1400_v12 = vpop.permute.xlu0 %1399 }
 0x38d   : > { %v1554_v60 = vsub.f32 %v2940_v16, %v1511_v58  ;;  %v1442_v20 = vsub.f32 %v2956_v49, %v1400_v12  ;;  %v1569_v16 = vand.u32 2147483647, %v1553_v41  ;;  %v1582_v58 = vsel %vm291_vm0, %v1566_v26, 0.0 }
 0x38e   : > { %v1486_v12 = vadd.f32 %v1485_v5, %v1484_v28  ;;  %v1472_v53 = vsel %vm291_vm0, %v1457_v15, 0.0 }
 0x38f   : > { %v1570_v18 = vand.u32 2147483647, %v1554_v60  ;;  %v1458_v57 = vand.u32 2147483647, %v1442_v20  ;;  %v1598_v27 = vsel %vm291_vm0, %v1569_v16, 0.0 }
 0x390   : > { %v1402_v42 = vpop.permute.xlu1 %1401  ;;  %v1513_v59 = vpop.permute.xlu0 %1512 }
 0x391   : > { %v1443_v25 = vsub.f32 %v2948_v47, %v1402_v42  ;;  %v1555_v3 = vsub.f32 %v2956_v49, %v1513_v59  ;;  %v1585_v36 = vsel %vm291_vm0, %v1570_v18, 0.0  ;;  %v1487_v22 = vsel %vm291_vm0, %v1458_v57, 0.0 }
 0x392   : > { %v1488_v52 = vadd.f32 %v1487_v22, %v1486_v12 }
 0x393   : > { %v1459_v42 = vand.u32 2147483647, %v1443_v25  ;;  %v1571_v59 = vand.u32 2147483647, %v1555_v3 }
 0x394   : > { %v1515_v33 = vpop.permute.xlu1 %1514  ;;  %v1404_v45 = vpop.permute.xlu0 %1403 }
 0x395   : > { %v1556_v49 = vsub.f32 %v2948_v47, %v1515_v33  ;;  %v1444_v54 = vsub.f32 %v2965_v17, %v1404_v45  ;;  %v1584_v33 = vadd.f32 %v1583_v55, %v1582_v58  ;;  %v1597_v45 = vsel %vm291_vm0, %v1567_v43, 0.0 }
 0x396   : > { %v1474_v2 = vsel %vm291_vm0, %v1459_v42, 0.0  ;;  %v1600_v56 = vsel %vm291_vm0, %v1571_v59, 0.0 }
 0x397   : > { %v1572_v32 = vand.u32 2147483647, %v1556_v49  ;;  %v1460_v37 = vand.u32 2147483647, %v1444_v54 }
 0x398   : > { %v3436_v38 = vpop.permute.xlu1 %1165  ;;  %v3438_v19 = vpop.permute.xlu0 %1516 }
 0x399   : > { %v1204_v14 = vsub.f32 %v2971_v63, %v3436_v38  ;;  %v1557_v24 = vsub.f32 %v2965_v17, %v3438_v19  ;;  %v1473_v17 = vadd.f32 %v1472_v53, %v1471_v11  ;;  %v1599_v19 = vadd.f32 %v1598_v27, %v1597_v45 }
 0x39a   : > { %v1587_v31 = vsel %vm291_vm0, %v1572_v32, 0.0  ;;  %v1489_v44 = vsel %vm291_vm0, %v1460_v37, 0.0  ;;  %v1918_v37 = vld [vmem:[%s2263_s28 + $0x50] sm:$0xff] }
 0x39b   : > { %v1220_v34 = vand.u32 2147483647, %v1204_v14  ;;  %v1573_v0 = vand.u32 2147483647, %v1557_v24  ;;  %v1490_v43 = vadd.f32 %v1489_v44, %v1488_v52 }
 0x39c   : > { %v3440_v6 = vpop.permute.xlu1 %1407  ;;  %v3442_v7 = vpop.permute.xlu0 %1405 }
 0x39d   : > { %v1446_v4 = vsub.f32 %v2971_v63, %v3440_v6  ;;  %v1445_v38 = vsub.f32 %v2960_v13, %v3442_v7  ;;  %v1586_v6 = vadd.f32 %v1585_v36, %v1584_v33  ;;  %v1249_v3 = vsel %vm291_vm0, %v1220_v34, 0.0 }
 0x39e   : > { %v1602_v28 = vsel %vm291_vm0, %v1573_v0, 0.0  ;;  %v1250_v58 = vadd.f32 %v1249_v3, %v3416_v30  ;;  %v1919_v0 = vld [vmem:[%s2263_s28 + $0x60] sm:$0xff]  ;;  %v1920_v3 = vld [vmem:[%s2263_s28 + $0x78] sm:$0xff] }
 0x39f   : > { %v1462_v26 = vand.u32 2147483647, %v1446_v4  ;;  %v1461_v25 = vand.u32 2147483647, %v1445_v38  ;;  %v1588_v16 = vadd.f32 %v1587_v31, %v1586_v6 }
 0x3a0   : > { %v3449_v39 = vpop.permute.xlu1 %1520  ;;  %v3451_v9 = vpop.permute.xlu0 %1518 }
 0x3a1   : > { %v1559_v41 = vsub.f32 %v2971_v63, %v3449_v39  ;;  %v1558_v62 = vsub.f32 %v2960_v13, %v3451_v9  ;;  %v1475_v63 = vadd.f32 %v1474_v2, %v1473_v17  ;;  %v1601_v39 = vadd.f32 %v1600_v56, %v1599_v19 }
 0x3a2   : > { %v1491_v11 = vsel %vm291_vm0, %v1462_v26, 0.0  ;;  %v1476_v55 = vsel %vm291_vm0, %v1461_v25, 0.0 }
 0x3a3   : > { %v1574_v5 = vand.u32 2147483647, %v1558_v62  ;;  %v1603_v12 = vadd.f32 %v1602_v28, %v1601_v39  ;;  %v1477_v36 = vadd.f32 %v1476_v55, %v1475_v63 }
 0x3a4   : > { %v3457_v10 = vpop.permute.xlu1 %1169  ;;  %v3459_v21 = vpop.permute.xlu0 %1167 }
 0x3a5   : > { %v1206_v7 = vsub.f32 %v2984_v40, %v3457_v10  ;;  %v1205_v29 = vsub.f32 %v2975_v61, %v3459_v21  ;;  %v1575_v10 = vand.u32 2147483647, %v1559_v41  ;;  %v1589_v27 = vsel %vm291_vm0, %v1574_v5, 0.0 }
 0x3a6   : > { %v1590_v17 = vadd.f32 %v1589_v27, %v1588_v16 }
 0x3a7   : > { %v1222_v18 = vand.u32 2147483647, %v1206_v7  ;;  %v1221_v57 = vand.u32 2147483647, %v1205_v29  ;;  %v1604_v53 = vsel %vm291_vm0, %v1575_v10, 0.0  ;;  %v1921_v10 = vld [vmem:[%s2263_s28 + $0x70] sm:$0xff] }
 0x3a8   : > { %v3471_v8 = vpop.permute.xlu1 %1411  ;;  %v3473_v46 = vpop.permute.xlu0 %1409  ;;  %v1605_v38 = vadd.f32 %v1604_v53, %v1603_v12 }
 0x3a9   : > { %v1448_v49 = vsub.f32 %v2984_v40, %v3471_v8  ;;  %v1447_v54 = vsub.f32 %v2975_v61, %v3473_v46  ;;  %v1492_v8 = vadd.f32 %v1491_v11, %v1490_v43  ;;  %v1251_v61 = vsel %vm291_vm0, %v1222_v18, 0.0 }
 0x3aa   : > { %v1236_v30 = vsel %vm291_vm0, %v1221_v57, 0.0 }
 0x3ab   : > { %v1464_v46 = vand.u32 2147483647, %v1448_v49  ;;  %v1463_v22 = vand.u32 2147483647, %v1447_v54 }
 0x3ac   : > { %v3488_v51 = vpop.permute.xlu1 %1524  ;;  %v3490_v47 = vpop.permute.xlu0 %1522 }
 0x3ad   : > { %v1561_v32 = vsub.f32 %v2984_v40, %v3488_v51  ;;  %v1560_v4 = vsub.f32 %v1918_v37, %v3490_v47  ;;  %v1237_v40 = vadd.f32 %v1236_v30, %v3476_v48  ;;  %v1493_v6 = vsel %vm291_vm0, %v1464_v46, 0.0 }
 0x3ae   : > { %v1478_v52 = vsel %vm291_vm0, %v1463_v22, 0.0 }
 0x3af   : > { %v1577_v7 = vand.u32 2147483647, %v1561_v32  ;;  %v1576_v29 = vand.u32 2147483647, %v1560_v4 }
 0x3b0   : > { %v1174_v60 = vpop.permute.xlu1 %1173  ;;  %v1172_v20 = vpop.permute.xlu0 %1171 }
 0x3b1   : > { %v1208_v13 = vsub.f32 %v2996_v50, %v1174_v60  ;;  %v1207_v9 = vsub.f32 %v2988_v23, %v1172_v20  ;;  %v1252_v20 = vadd.f32 %v1251_v61, %v1250_v58  ;;  %v1606_v18 = vsel %vm291_vm0, %v1577_v7, 0.0 }
 0x3b2   : > { %v1591_v57 = vsel %vm291_vm0, %v1576_v29, 0.0 }
 0x3b3   : > { %v1224_v42 = vand.u32 2147483647, %v1208_v13  ;;  %v1223_v59 = vand.u32 2147483647, %v1207_v9 }
 0x3b4   : > { %v1416_v15 = vpop.permute.xlu1 %1415  ;;  %v1414_v21 = vpop.permute.xlu0 %1413 }
 0x3b5   : > { %v1450_v14 = vsub.f32 %v2996_v50, %v1416_v15  ;;  %v1449_v24 = vsub.f32 %v2988_v23, %v1414_v21  ;;  %v1253_v23 = vsel %vm291_vm0, %v1224_v42, 0.0  ;;  %v1238_v19 = vsel %vm291_vm0, %v1223_v59, 0.0 }
 0x3b6   : > { %v1239_v31 = vadd.f32 %v1238_v19, %v1237_v40  ;;  %v1494_v15 = vadd.f32 %v1493_v6, %v1492_v8  ;;  %v1479_v21 = vadd.f32 %v1478_v52, %v1477_v36 }
 0x3b7   : > { %v1466_v2 = vand.u32 2147483647, %v1450_v14  ;;  %v1465_v56 = vand.u32 2147483647, %v1449_v24 }
 0x3b8   : > { %v1529_v33 = vpop.permute.xlu1 %1528  ;;  %v1527_v45 = vpop.permute.xlu0 %1526 }
 0x3b9   : > { %v1563_v34 = vsub.f32 %v2996_v50, %v1529_v33  ;;  %v1562_v41 = vsub.f32 %v1919_v0, %v1527_v45  ;;  %v1254_v50 = vadd.f32 %v1253_v23, %v1252_v20  ;;  %v1495_v25 = vsel %vm291_vm0, %v1466_v2, 0.0 }
 0x3ba   : > { %v1480_v48 = vsel %vm291_vm0, %v1465_v56, 0.0  ;;  %v1496_v49 = vadd.f32 %v1495_v25, %v1494_v15  ;;  %v1607_v33 = vadd.f32 %v1606_v18, %v1605_v38  ;;  %v1592_v45 = vadd.f32 %v1591_v57, %v1590_v17 }
 0x3bb   : > { %v1579_v63 = vand.u32 2147483647, %v1563_v34  ;;  %v1481_v54 = vadd.f32 %v1480_v48, %v1479_v21 }
 0x3bc   : > { %v1178_v62 = vpop.permute.xlu1 %1177  ;;  %v1176_v60 = vpop.permute.xlu0 %1175 }
 0x3bd   : > { %v1210_v51 = vsub.f32 %v3007_v35, %v1178_v62  ;;  %v1209_v47 = vsub.f32 %v3000_v1, %v1176_v60  ;;  %v1578_v35 = vand.u32 2147483647, %v1562_v41  ;;  %v1608_v58 = vsel %vm291_vm0, %v1579_v63, 0.0 }
 0x3be   : > { %v1609_v46 = vadd.f32 %v1608_v58, %v1607_v33 }
 0x3bf   : > { %v1226_v44 = vand.u32 2147483647, %v1210_v51  ;;  %v1225_v26 = vand.u32 2147483647, %v1209_v47  ;;  %v1593_v12 = vsel %vm291_vm0, %v1578_v35, 0.0 }
 0x3c0   : > { %v1420_v39 = vpop.permute.xlu1 %1419  ;;  %v1418_v1 = vpop.permute.xlu0 %1417  ;;  %v1594_v22 = vadd.f32 %v1593_v12, %v1592_v45 }
 0x3c1   : > { %v1255_v13 = vsel %vm291_vm0, %v1226_v44, 0.0  ;;  %v1240_v9 = vsel %vm291_vm0, %v1225_v26, 0.0  ;;  %v1452_v28 = vsub.f32 %v1920_v3, %v1420_v39  ;;  %v1451_v5 = vsub.f32 %v1921_v10, %v1418_v1 }
 0x3c2   : > { %v1256_v16 = vadd.f32 %v1255_v13, %v1254_v50  ;;  %v1241_v43 = vadd.f32 %v1240_v9, %v1239_v31 }
 0x3c3   : > { %v1468_v11 = vand.u32 2147483647, %v1452_v28  ;;  %v1467_v55 = vand.u32 2147483647, %v1451_v5 }
 0x3c4   : > { %1799 = vst.msk [vmem:[%s2447_s21 + $0x68] sm:$0xff] %vm291_vm0, %v1256_v16  ;;  %1798 = vst.msk [vmem:[%s2447_s21 + $0x60] sm:$0xff] %vm291_vm0, %v1241_v43  ;;  %v1533_v42 = vpop.permute.xlu1 %1532  ;;  %v1531_v59 = vpop.permute.xlu0 %1530 }
 0x3c5   : > { %v1497_v53 = vsel %vm291_vm0, %v1468_v11, 0.0  ;;  %v1482_v27 = vsel %vm291_vm0, %v1467_v55, 0.0  ;;  %v1565_v14 = vsub.f32 %v1920_v3, %v1533_v42  ;;  %v1564_v24 = vsub.f32 %v1921_v10, %v1531_v59 }
 0x3c6   : > { %v1498_v8 = vadd.f32 %v1497_v53, %v1496_v49  ;;  %v1483_v36 = vadd.f32 %v1482_v27, %v1481_v54 }
 0x3c7   : > { %v1581_v61 = vand.u32 2147483647, %v1565_v14  ;;  %v1580_v30 = vand.u32 2147483647, %v1564_v24 }
 0x3c8   : > { %1817 = vst.msk [vmem:[%s2447_s21 + $0x18] sm:$0xff] %vm291_vm0, %v1498_v8  ;;  %1816 = vst.msk [vmem:[%s2447_s21 + $0x10] sm:$0xff] %vm291_vm0, %v1483_v36 }
 0x3c9   : > { %v1610_v32 = vsel %vm291_vm0, %v1581_v61, 0.0  ;;  %v1595_v37 = vsel %vm291_vm0, %v1580_v30, 0.0 }
 0x3ca   : > { %v1611_v4 = vadd.f32 %v1610_v32, %v1609_v46  ;;  %v1596_v38 = vadd.f32 %v1595_v37, %v1594_v22 }
 0x3cc   : > { %1819 = vst.msk [vmem:[%s2447_s21 + $0x58] sm:$0xff] %vm291_vm0, %v1611_v4  ;;  %1818 = vst.msk [vmem:[%s2447_s21 + $0x50] sm:$0xff] %vm291_vm0, %v1596_v38 }
 0x3cd   : > { %1995 = shalt.err (!%p1992_p11)
}
 0x3ce   : > { %s1996_s28 = scalar_lea.hbm %s3568_s18, 2048  ;;  %s2000_s3 = scalar_lea.hbm %s3625_s2, 4096 }
 0x3cf   : > { %p1997_p1 = scmp.ne.s32.totalorder %s3568_s18, %s1996_s28  ;;  %p2001_p5 = scmp.lt.u32.totalorder %s3568_s18, %s3625_s2 }
 0x3d0   : > { %p2002_p4 = scmp.lt.u32.totalorder %s2000_s3, %s1996_s28  ;;  %p2004_p0 = scmp.lt.u32.totalorder %s1996_s28, %s3568_s18 }
 0x3d1   : > { %p1998_p6 = pnand %p1997_p1, %p3644_p3 }
 0x3d2   : > { %p2003_p8 = por %p2002_p4, %p2001_p5 }
 0x3d3   : > { %p1999_p2 = pneg %p1998_p6 }
 0x3d4   : > { %p2005_p12 = por %p2004_p0, %p2003_p8 }
 0x3d6   : > { %p2006_p13 = pnand %p2005_p12, %p1999_p2 }
 0x3d8   : > { %2009 = shalt.err (!%p2006_p13)
}
 0x3d9   : > { %s2078_s19 = smov 128   ;;  %s2079_s26 = smov 8  }
 0x3da   : > { %1832 = dma.vmem_to_hbm [thread:$0]  (%p3644_p3), %s3570_s8, 2048, %s3568_s18, %s1616_s12, %s2078_s19, %s2078_s19, %s2079_s26  }
 0x3db PF: > { %s1646_s30 = sand.u32 1, %s2048_s9   ;;  %p3645_p7 = scmp.ne.s32.totalorder %s3635_s24, 0 }
 0x3dc   : > { %p3646_p10 = scmp.ge.s32.totalorder %s2068_s14, 2  ;;  %s1647_s16 = scalar_lea.sflag [#allocation4], %s1646_s30 }
 0x3de   : > { %p1842_p9 = pnand %p3646_p10, %p3645_p7 }
 0x3e0   : > { %2043 = dma.done.wait (!%p1842_p9), %s1647_s16, 2048  }
 0x3e1   : > { %2045 = vsyncadd (!%p1842_p9), %s1647_s16, 4294965248  ;;  %s21_s14 = sadd.s32 1, %s2068_s14   ;;  %s3647_s9 = smov %s2052_s10 }
 0x3e2   : > { %p18_p11 = scmp.ge.s32.totalorder %s21_s14, 4   ;;  %s3648_s10 = smov %s2056_s11 }
 0x3e3   : > { %s3649_s11 = smov %s2151_s23  ;;  %s3650_s12 = smov %s2064_s13 }
 0x3e4   : > { %s3651_s13 = smov %s3653_s17  ;;  %20 = sbr.rel (!%p18_p11) target bundleno = 8 (0x8), region = 96 }
 0x3eb   :  { %1652 = vsyncpa [#allocation3], 1 }
 0x3ec   :  { %1654 = vsyncpa [#allocation3 + $0x1], 1 }
 0x3ed   :  { %1655 = vsyncpa [#allocation6], 1 }
 0x3ee   :  { %1657 = vsyncpa [#allocation6 + $0x1], 1 }
 0x3ef   :  { %1658 = vsyncpa [#allocation4], 1 }
 0x3f0   :  { %1660 = vsyncpa [#allocation4 + $0x1], 1 }

</bundles_post_ra>
